<compile_context>
chip_gen: v7x
topology: tpu7x:2x2x1
jax: 0.10.0
libtpu: 0.0.40
codegen_flags: <defaults>
</compile_context>

<pallas_src>
import functools

import jax
import jax.numpy as jnp
from jax.experimental import pallas as pl
from jax.experimental.pallas import tpu as pltpu


def _round_up(x, m):
    return (x + m - 1) // m * m


@functools.lru_cache(maxsize=None)
def _vmem_limit_bytes():
    # Generation-aware VMEM budget: ~3/4 of physical capacity, capped at
    # 100 MiB (v5e/v6e: 128 MiB -> 96 MiB; v7x: 64 MiB -> 48 MiB).
    try:
        cap = int(pltpu.get_tpu_info().vmem_capacity_bytes)
        return min(cap * 3 // 4, 100 * 1024 * 1024)
    except Exception:
        return 48 * 1024 * 1024


# ----------------------------------------------------------------------------
# Conv2d (valid padding) + ReLU with IN-KERNEL im2col.
# The wrapper space-to-depths the input so the kernel only sees stride-1
# convs; the kernel extracts kp x kp contiguous windows in VMEM, concatenates
# them on the feature (lane) axis, and runs a single MXU matmul per grid step.
# ----------------------------------------------------------------------------
def _conv_im2col_kernel(x_ref, w_ref, b_ref, o_ref, *, kp, oh, ow_pad):
    # x_ref: (TB, hs, ws_pad, Cs) bf16   (space-to-depth'd input strip)
    # w_ref: (kp*kp*Cs, O) bf16          (pre-arranged in prepare_params)
    # b_ref: (1, O) f32,  o_ref: (TB, oh, ow_pad, O) bf16
    tb = x_ref.shape[0]
    cs = x_ref.shape[3]

    slabs = []
    for i in range(kp):
        for j in range(kp):
            # Contiguous (unit-stride) window slice; order (i, j, c) matches
            # the prepared weight row order.
            slabs.append(x_ref[:, i:i + oh, j:j + ow_pad, :])
    patches = jnp.concatenate(slabs, axis=-1)            # (TB, oh, ow_pad, kp*kp*Cs)

    m = tb * oh * ow_pad
    # ow_pad is a multiple of 8, so this leading-dim collapse is layout-trivial.
    patches = patches.reshape(m, kp * kp * cs)

    acc = jnp.dot(patches, w_ref[...], preferred_element_type=jnp.float32)
    acc = jnp.maximum(acc + b_ref[...], 0.0)              # f32 epilogue
    o_ref[...] = acc.reshape(tb, oh, ow_pad, -1).astype(o_ref.dtype)


def conv2d_relu(x_nhwc, w2d, b, *, k, stride, out_channels, tb_max=8):
    """Valid Conv2d + ReLU on bf16 NHWC activations, fully inside Pallas.

    x_nhwc: (N, H, W, C) bf16.  w2d: (k*k*C, O) bf16 prepared by
    prepare_params (space-to-depth row order).  b: (O,) f32.
    Returns (N, oh, ow, O) bf16.
    """
    N, H, W, C = x_nhwc.shape
    s = stride
    oh = (H - k) // s + 1
    ow = (W - k) // s + 1
    kp = k // s
    assert kp * s == k, "stride must divide kernel size for space-to-depth"

    # Space-to-depth: stride-s conv -> stride-1 conv with kernel kp and
    # s*s*C channels.  O(activation) relayout (XLA), no patch inflation.
    hu, wu = s * (oh - 1) + k, s * (ow - 1) + k            # used input region
    x = x_nhwc[:, :hu, :wu, :]
    if s > 1:
        x = x.reshape(N, hu // s, s, wu // s, s, C)
        x = x.transpose(0, 1, 3, 2, 4, 5).reshape(N, hu // s, wu // s, s * s * C)
    hs, ws, cs = x.shape[1], x.shape[2], x.shape[3]

    # Pad output width to a sublane multiple so the in-kernel reshape is a
    # pure view; the padded columns are dropped after the call.
    ow_pad = _round_up(ow, 8)
    ws_pad = ow_pad + kp - 1
    if ws_pad > ws:
        x = jnp.pad(x, ((0, 0), (0, 0), (0, ws_pad - ws), (0, 0)))

    # Batch tile: >=2 grid steps when possible so both v7x TensorCores work.
    tb = max(1, min(tb_max, N // 2)) if N >= 2 else 1
    n_pad = _round_up(N, tb)
    if n_pad != N:
        x = jnp.pad(x, ((0, n_pad - N), (0, 0), (0, 0), (0, 0)))

    kernel = functools.partial(_conv_im2col_kernel, kp=kp, oh=oh, ow_pad=ow_pad)
    out = pl.pallas_call(
        kernel,
        out_shape=jax.ShapeDtypeStruct((n_pad, oh, ow_pad, out_channels),
                                       jnp.bfloat16),
        grid=(n_pad // tb,),
        in_specs=[
            pl.BlockSpec((tb, hs, ws_pad, cs), lambda i: (i, 0, 0, 0)),
            pl.BlockSpec((kp * kp * cs, out_channels), lambda i: (0, 0)),
            pl.BlockSpec((1, out_channels), lambda i: (0, 0)),
        ],
        out_specs=pl.BlockSpec((tb, oh, ow_pad, out_channels),
                               lambda i: (i, 0, 0, 0)),
        compiler_params=pltpu.CompilerParams(
            dimension_semantics=("parallel",),
            vmem_limit_bytes=_vmem_limit_bytes(),
        ),
    )(x, w2d, b.reshape(1, out_channels))
    # Drop batch / width padding (cheap O(activation); fuses with the next
    # layer's space-to-depth reshape in XLA).
    return out[:N, :, :ow, :]


# ----------------------------------------------------------------------------
# Fused FC head:  q = relu(x @ w1 + b1) @ w2 + b2
# The 512-wide hidden is processed in 128-wide chunks that stay in VMEM/vregs.
# ----------------------------------------------------------------------------
def _fused_mlp_kernel(x_ref, w1_ref, b1_ref, w2_ref, b2_ref, o_ref, *, h_chunk):
    x = x_ref[...]                                         # (tm, K) bf16
    hdim = w1_ref.shape[1]
    acc = jnp.zeros(o_ref.shape, jnp.float32)
    for h0 in range(0, hdim, h_chunk):
        h = jnp.dot(x, w1_ref[:, h0:h0 + h_chunk],
                    preferred_element_type=jnp.float32)
        h = jnp.maximum(h + b1_ref[:, h0:h0 + h_chunk], 0.0)
        acc = acc + jnp.dot(h.astype(jnp.bfloat16), w2_ref[h0:h0 + h_chunk, :],
                            preferred_element_type=jnp.float32)
    o_ref[...] = (acc + b2_ref[...]).astype(o_ref.dtype)


def pallas_mlp_head(x, w1, b1, w2, b2, *, tm_max=512, h_chunk=128):
    """x: (M, K) bf16 -> relu(x@w1+b1)@w2+b2, shape (M, A) f32."""
    M, K = x.shape
    K2, H = w1.shape
    H2, A = w2.shape
    assert K == K2 and H == H2 and H % h_chunk == 0

    m_pad = _round_up(M, 8)
    tm = min(tm_max, m_pad)
    if m_pad // tm < 2 and m_pad >= 16:
        tm = _round_up(m_pad // 2, 8)        # >=2 M-tiles -> both v7x cores
    m_pad = _round_up(m_pad, tm)
    if m_pad != M:
        x = jnp.pad(x, ((0, m_pad - M), (0, 0)))

    kernel = functools.partial(_fused_mlp_kernel, h_chunk=h_chunk)
    out = pl.pallas_call(
        kernel,
        out_shape=jax.ShapeDtypeStruct((m_pad, A), jnp.float32),
        grid=(m_pad // tm,),
        in_specs=[
            pl.BlockSpec((tm, K), lambda i: (i, 0)),
            pl.BlockSpec((K, H), lambda i: (0, 0)),
            pl.BlockSpec((1, H), lambda i: (0, 0)),
            pl.BlockSpec((H, A), lambda i: (0, 0)),
            pl.BlockSpec((1, A), lambda i: (0, 0)),
        ],
        out_specs=pl.BlockSpec((tm, A), lambda i: (i, 0)),
        compiler_params=pltpu.CompilerParams(
            dimension_semantics=("parallel",),
            vmem_limit_bytes=_vmem_limit_bytes(),
        ),
    )(x, w1, b1.reshape(1, H), w2, b2.reshape(1, A))
    return out[:M]


# ----------------------------------------------------------------------------
# DQN parameters (PyTorch layout) + one-time kernel-layout preparation
# ----------------------------------------------------------------------------
def conv_out(h, k, s):
    return (h - k) // s + 1


def feature_dims(input_shape):
    c, h, w = input_shape
    h1, w1 = conv_out(h, 8, 4), conv_out(w, 8, 4)
    h2, w2 = conv_out(h1, 4, 2), conv_out(w1, 4, 2)
    h3, w3 = conv_out(h2, 3, 1), conv_out(w2, 3, 1)
    return h3, w3


def init_params(key, input_shape, num_actions):
    """Parameters in the exact PyTorch shapes/layouts of the reference module."""
    c = input_shape[0]
    h3, w3 = feature_dims(input_shape)
    feat = 64 * h3 * w3
    ks = jax.random.split(key, 10)
    scale = 0.05
    return {
        "conv1_w": scale * jax.random.normal(ks[0], (32, c, 8, 8), jnp.float32),
        "conv1_b": scale * jax.random.normal(ks[1], (32,), jnp.float32),
        "conv2_w": scale * jax.random.normal(ks[2], (64, 32, 4, 4), jnp.float32),
        "conv2_b": scale * jax.random.normal(ks[3], (64,), jnp.float32),
        "conv3_w": scale * jax.random.normal(ks[4], (64, 64, 3, 3), jnp.float32),
        "conv3_b": scale * jax.random.normal(ks[5], (64,), jnp.float32),
        "fc1_w": scale * jax.random.normal(ks[6], (512, feat), jnp.float32),
        "fc1_b": scale * jax.random.normal(ks[7], (512,), jnp.float32),
        "fc2_w": scale * jax.random.normal(ks[8], (num_actions, 512), jnp.float32),
        "fc2_b": scale * jax.random.normal(ks[9], (num_actions,), jnp.float32),
    }


def prepare_params(params, input_shape):
    """One-time conversion to kernel layouts (run once, outside jit).

    - Conv weights (O, C, kh, kw) -> (kp*kp*s*s*C, O) rows ordered
      (i', j', a, b, c) to match the in-kernel space-to-depth im2col.
    - fc1 rows permuted from the PyTorch (C, H, W) flatten to our NHWC
      (H, W, C) flatten; fc2 pre-transposed.
    - All matmul weights cast to bf16 once; biases stay f32 (f32 epilogue)."""
    h3, w3 = feature_dims(input_shape)

    def conv_w(wt, s):
        o, c, k, _ = wt.shape
        kp = k // s
        w = wt.transpose(2, 3, 1, 0)                       # (kh, kw, c, o)
        w = w.reshape(kp, s, kp, s, c, o).transpose(0, 2, 1, 3, 4, 5)
        return w.reshape(kp * kp * s * s * c, o).astype(jnp.bfloat16)

    fc1_w = (params["fc1_w"].reshape(512, 64, h3, w3)
             .transpose(2, 3, 1, 0)                        # (h3, w3, 64, 512)
             .reshape(h3 * w3 * 64, 512).astype(jnp.bfloat16))
    return {
        "conv1_w": conv_w(params["conv1_w"], 4), "conv1_b": params["conv1_b"],
        "conv2_w": conv_w(params["conv2_w"], 2), "conv2_b": params["conv2_b"],
        "conv3_w": conv_w(params["conv3_w"], 1), "conv3_b": params["conv3_b"],
        "fc1_w": fc1_w, "fc1_b": params["fc1_b"],
        "fc2_w": params["fc2_w"].T.astype(jnp.bfloat16), "fc2_b": params["fc2_b"],
    }


def dqn_forward(p, x_nchw):
    """x: (N, C, H, W) float32 -> (N, num_actions) float32."""
    x = jnp.transpose(x_nchw, (0, 2, 3, 1)).astype(jnp.bfloat16)  # NHWC, bf16 once
    x = conv2d_relu(x, p["conv1_w"], p["conv1_b"], k=8, stride=4, out_channels=32)
    x = conv2d_relu(x, p["conv2_w"], p["conv2_b"], k=4, stride=2, out_channels=64)
    x = conv2d_relu(x, p["conv3_w"], p["conv3_b"], k=3, stride=1, out_channels=64)
    n = x.shape[0]
    x = x.reshape(n, -1)                                    # NHWC flatten (bf16)
    return pallas_mlp_head(x, p["fc1_w"], p["fc1_b"], p["fc2_w"], p["fc2_b"])


if __name__ == "__main__":
    # Small but conv-chain-valid shapes: 36x36 -> 8x8 -> 3x3 -> 1x1
    input_shape = (4, 36, 36)     # (C, H, W), e.g. 4 stacked frames
    num_actions = 6
    batch = 2

    key = jax.random.PRNGKey(0)
    pkey, xkey = jax.random.split(key)
    params = init_params(pkey, input_shape, num_actions)
    kparams = prepare_params(params, input_shape)   # one-time layout prep
    x = jax.random.normal(xkey, (batch,) + input_shape, jnp.float32)

    q_values = jax.jit(dqn_forward)(kparams, x)
    q_values = jax.block_until_ready(q_values)
    assert q_values.shape == (batch, num_actions)
    assert q_values.dtype == jnp.float32
    print("KERNEL_OK")
</pallas_src>

<mosaic_0001>
module attributes {stable_mosaic.version = 11 : i64} {
  func.func @_conv_im2col_kernel(%arg0: i32, %arg1: memref<1x9x9x64xbf16, #tpu.memory_space<vmem>>, %arg2: memref<256x32xbf16, #tpu.memory_space<vmem>>, %arg3: memref<1x32xf32, #tpu.memory_space<vmem>>, %arg4: memref<1x8x8x32xbf16, #tpu.memory_space<vmem>>) attributes {dimension_semantics = [#tpu.dimension_semantics<parallel>], iteration_bounds = array<i64: 2>, scalar_prefetch = 0 : i64, scratch_operands = 0 : i64, tpu.core_type = #tpu.core_type<tc>, window_params = [{transform_indices = @transform_0, window_bounds = array<i64: 1, 9, 9, 64>}, {pipeline_mode = #tpu.pipeline_mode<synchronous>, transform_indices = @transform_1, window_bounds = array<i64: 256, 32>}, {pipeline_mode = #tpu.pipeline_mode<synchronous>, transform_indices = @transform_2, window_bounds = array<i64: 1, 32>}, {transform_indices = @transform_3, window_bounds = array<i64: 1, 8, 8, 32>}]} {
    %c0 = arith.constant 0 : index
    %c0_0 = arith.constant 0 : index
    %c0_1 = arith.constant 0 : index
    %c0_2 = arith.constant 0 : index
    %0 = vector.load %arg1[%c0, %c0_0, %c0_1, %c0_2] : memref<1x9x9x64xbf16, #tpu.memory_space<vmem>>, vector<1x8x8x64xbf16>
    %c0_3 = arith.constant 0 : index
    %c0_4 = arith.constant 0 : index
    %c1 = arith.constant 1 : index
    %c0_5 = arith.constant 0 : index
    %1 = vector.load %arg1[%c0_3, %c0_4, %c1, %c0_5] : memref<1x9x9x64xbf16, #tpu.memory_space<vmem>>, vector<1x8x8x64xbf16>
    %c0_6 = arith.constant 0 : index
    %c1_7 = arith.constant 1 : index
    %c0_8 = arith.constant 0 : index
    %c0_9 = arith.constant 0 : index
    %2 = vector.load %arg1[%c0_6, %c1_7, %c0_8, %c0_9] : memref<1x9x9x64xbf16, #tpu.memory_space<vmem>>, vector<1x8x8x64xbf16>
    %c0_10 = arith.constant 0 : index
    %c1_11 = arith.constant 1 : index
    %c1_12 = arith.constant 1 : index
    %c0_13 = arith.constant 0 : index
    %3 = vector.load %arg1[%c0_10, %c1_11, %c1_12, %c0_13] : memref<1x9x9x64xbf16, #tpu.memory_space<vmem>>, vector<1x8x8x64xbf16>
    %4 = tpu.concatenate %0, %1, %2, %3 in 3 : vector<1x8x8x64xbf16>, vector<1x8x8x64xbf16>, vector<1x8x8x64xbf16>, vector<1x8x8x64xbf16> -> vector<1x8x8x256xbf16>
    %5 = vector.shape_cast %4 : vector<1x8x8x256xbf16> to vector<64x256xbf16>
    %c0_14 = arith.constant 0 : index
    %c0_15 = arith.constant 0 : index
    %6 = vector.load %arg2[%c0_14, %c0_15] : memref<256x32xbf16, #tpu.memory_space<vmem>>, vector<256x32xbf16>
    %cst = arith.constant dense<0.000000e+00> : vector<64x32xf32>
    %7 = tpu.matmul %5, %6, %cst {dimension_numbers = #tpu.dot_dimension_numbers<[1], [0], [0], [1], [0, 0, 1, 1], [], []>} : vector<64x256xbf16>, vector<256x32xbf16>, vector<64x32xf32> -> vector<64x32xf32>
    %c0_16 = arith.constant 0 : index
    %c0_17 = arith.constant 0 : index
    %8 = vector.load %arg3[%c0_16, %c0_17] : memref<1x32xf32, #tpu.memory_space<vmem>>, vector<1x32xf32>
    %9 = vector.broadcast %8 : vector<1x32xf32> to vector<64x32xf32>
    %10 = arith.addf %7, %9 : vector<64x32xf32>
    %cst_18 = arith.constant 0.000000e+00 : f32
    %11 = vector.broadcast %cst_18 : f32 to vector<64x32xf32>
    %12 = arith.maximumf %10, %11 : vector<64x32xf32>
    %13 = vector.shape_cast %12 : vector<64x32xf32> to vector<1x8x8x32xf32>
    %14 = arith.truncf %13 : vector<1x8x8x32xf32> to vector<1x8x8x32xbf16>
    %c0_19 = arith.constant 0 : index
    %c0_20 = arith.constant 0 : index
    %c0_21 = arith.constant 0 : index
    %c0_22 = arith.constant 0 : index
    %15 = vector.load %arg4[%c0_19, %c0_20, %c0_21, %c0_22] : memref<1x8x8x32xbf16, #tpu.memory_space<vmem>>, vector<1x8x8x32xbf16>
    tpu.vector_store %arg4[%c0_19, %c0_20, %c0_21, %c0_22], %14 {strides = array<i32>} : memref<1x8x8x32xbf16, #tpu.memory_space<vmem>>, vector<1x8x8x32xbf16>,
    return
  }
  func.func @transform_0(%arg0: i32) -> (i32, i32, i32, i32) {
    %c0_i32 = arith.constant 0 : i32
    %c0_i32_0 = arith.constant 0 : i32
    %c0_i32_1 = arith.constant 0 : i32
    %c0_i32_2 = arith.constant 0 : i32
    return %arg0, %c0_i32, %c0_i32_0, %c0_i32_1 : i32, i32, i32, i32
  }
  func.func @transform_1(%arg0: i32) -> (i32, i32) {
    %c0_i32 = arith.constant 0 : i32
    %c0_i32_0 = arith.constant 0 : i32
    %c0_i32_1 = arith.constant 0 : i32
    return %c0_i32, %c0_i32_0 : i32, i32
  }
  func.func @transform_2(%arg0: i32) -> (i32, i32) {
    %c0_i32 = arith.constant 0 : i32
    %c0_i32_0 = arith.constant 0 : i32
    %c0_i32_1 = arith.constant 0 : i32
    return %c0_i32, %c0_i32_0 : i32, i32
  }
  func.func @transform_3(%arg0: i32) -> (i32, i32, i32, i32) {
    %c0_i32 = arith.constant 0 : i32
    %c0_i32_0 = arith.constant 0 : i32
    %c0_i32_1 = arith.constant 0 : i32
    %c0_i32_2 = arith.constant 0 : i32
    return %arg0, %c0_i32, %c0_i32_0, %c0_i32_1 : i32, i32, i32, i32
  }
}

module attributes {stable_mosaic.version = 11 : i64} {
  func.func @_conv_im2col_kernel(%arg0: i32, %arg1: memref<1x4x9x128xbf16, #tpu.memory_space<vmem>>, %arg2: memref<512x64xbf16, #tpu.memory_space<vmem>>, %arg3: memref<1x64xf32, #tpu.memory_space<vmem>>, %arg4: memref<1x3x8x64xbf16, #tpu.memory_space<vmem>>) attributes {dimension_semantics = [#tpu.dimension_semantics<parallel>], iteration_bounds = array<i64: 2>, scalar_prefetch = 0 : i64, scratch_operands = 0 : i64, tpu.core_type = #tpu.core_type<tc>, window_params = [{transform_indices = @transform_0, window_bounds = array<i64: 1, 4, 9, 128>}, {pipeline_mode = #tpu.pipeline_mode<synchronous>, transform_indices = @transform_1, window_bounds = array<i64: 512, 64>}, {pipeline_mode = #tpu.pipeline_mode<synchronous>, transform_indices = @transform_2, window_bounds = array<i64: 1, 64>}, {transform_indices = @transform_3, window_bounds = array<i64: 1, 3, 8, 64>}]} {
    %c0 = arith.constant 0 : index
    %c0_0 = arith.constant 0 : index
    %c0_1 = arith.constant 0 : index
    %c0_2 = arith.constant 0 : index
    %0 = vector.load %arg1[%c0, %c0_0, %c0_1, %c0_2] : memref<1x4x9x128xbf16, #tpu.memory_space<vmem>>, vector<1x3x8x128xbf16>
    %c0_3 = arith.constant 0 : index
    %c0_4 = arith.constant 0 : index
    %c1 = arith.constant 1 : index
    %c0_5 = arith.constant 0 : index
    %1 = vector.load %arg1[%c0_3, %c0_4, %c1, %c0_5] : memref<1x4x9x128xbf16, #tpu.memory_space<vmem>>, vector<1x3x8x128xbf16>
    %c0_6 = arith.constant 0 : index
    %c1_7 = arith.constant 1 : index
    %c0_8 = arith.constant 0 : index
    %c0_9 = arith.constant 0 : index
    %2 = vector.load %arg1[%c0_6, %c1_7, %c0_8, %c0_9] : memref<1x4x9x128xbf16, #tpu.memory_space<vmem>>, vector<1x3x8x128xbf16>
    %c0_10 = arith.constant 0 : index
    %c1_11 = arith.constant 1 : index
    %c1_12 = arith.constant 1 : index
    %c0_13 = arith.constant 0 : index
    %3 = vector.load %arg1[%c0_10, %c1_11, %c1_12, %c0_13] : memref<1x4x9x128xbf16, #tpu.memory_space<vmem>>, vector<1x3x8x128xbf16>
    %4 = tpu.concatenate %0, %1, %2, %3 in 3 : vector<1x3x8x128xbf16>, vector<1x3x8x128xbf16>, vector<1x3x8x128xbf16>, vector<1x3x8x128xbf16> -> vector<1x3x8x512xbf16>
    %5 = vector.shape_cast %4 : vector<1x3x8x512xbf16> to vector<24x512xbf16>
    %c0_14 = arith.constant 0 : index
    %c0_15 = arith.constant 0 : index
    %6 = vector.load %arg2[%c0_14, %c0_15] : memref<512x64xbf16, #tpu.memory_space<vmem>>, vector<512x64xbf16>
    %cst = arith.constant dense<0.000000e+00> : vector<24x64xf32>
    %7 = tpu.matmul %5, %6, %cst {dimension_numbers = #tpu.dot_dimension_numbers<[1], [0], [0], [1], [0, 0, 1, 1], [], []>} : vector<24x512xbf16>, vector<512x64xbf16>, vector<24x64xf32> -> vector<24x64xf32>
    %c0_16 = arith.constant 0 : index
    %c0_17 = arith.constant 0 : index
    %8 = vector.load %arg3[%c0_16, %c0_17] : memref<1x64xf32, #tpu.memory_space<vmem>>, vector<1x64xf32>
    %9 = vector.broadcast %8 : vector<1x64xf32> to vector<24x64xf32>
    %10 = arith.addf %7, %9 : vector<24x64xf32>
    %cst_18 = arith.constant 0.000000e+00 : f32
    %11 = vector.broadcast %cst_18 : f32 to vector<24x64xf32>
    %12 = arith.maximumf %10, %11 : vector<24x64xf32>
    %13 = vector.shape_cast %12 : vector<24x64xf32> to vector<1x3x8x64xf32>
    %14 = arith.truncf %13 : vector<1x3x8x64xf32> to vector<1x3x8x64xbf16>
    %c0_19 = arith.constant 0 : index
    %c0_20 = arith.constant 0 : index
    %c0_21 = arith.constant 0 : index
    %c0_22 = arith.constant 0 : index
    %15 = vector.load %arg4[%c0_19, %c0_20, %c0_21, %c0_22] : memref<1x3x8x64xbf16, #tpu.memory_space<vmem>>, vector<1x3x8x64xbf16>
    tpu.vector_store %arg4[%c0_19, %c0_20, %c0_21, %c0_22], %14 {strides = array<i32>} : memref<1x3x8x64xbf16, #tpu.memory_space<vmem>>, vector<1x3x8x64xbf16>,
    return
  }
  func.func @transform_0(%arg0: i32) -> (i32, i32, i32, i32) {
    %c0_i32 = arith.constant 0 : i32
    %c0_i32_0 = arith.constant 0 : i32
    %c0_i32_1 = arith.constant 0 : i32
    %c0_i32_2 = arith.constant 0 : i32
    return %arg0, %c0_i32, %c0_i32_0, %c0_i32_1 : i32, i32, i32, i32
  }
  func.func @transform_1(%arg0: i32) -> (i32, i32) {
    %c0_i32 = arith.constant 0 : i32
    %c0_i32_0 = arith.constant 0 : i32
    %c0_i32_1 = arith.constant 0 : i32
    return %c0_i32, %c0_i32_0 : i32, i32
  }
  func.func @transform_2(%arg0: i32) -> (i32, i32) {
    %c0_i32 = arith.constant 0 : i32
    %c0_i32_0 = arith.constant 0 : i32
    %c0_i32_1 = arith.constant 0 : i32
    return %c0_i32, %c0_i32_0 : i32, i32
  }
  func.func @transform_3(%arg0: i32) -> (i32, i32, i32, i32) {
    %c0_i32 = arith.constant 0 : i32
    %c0_i32_0 = arith.constant 0 : i32
    %c0_i32_1 = arith.constant 0 : i32
    %c0_i32_2 = arith.constant 0 : i32
    return %arg0, %c0_i32, %c0_i32_0, %c0_i32_1 : i32, i32, i32, i32
  }
}

module attributes {stable_mosaic.version = 11 : i64} {
  func.func @_conv_im2col_kernel(%arg0: i32, %arg1: memref<1x3x10x64xbf16, #tpu.memory_space<vmem>>, %arg2: memref<576x64xbf16, #tpu.memory_space<vmem>>, %arg3: memref<1x64xf32, #tpu.memory_space<vmem>>, %arg4: memref<1x1x8x64xbf16, #tpu.memory_space<vmem>>) attributes {dimension_semantics = [#tpu.dimension_semantics<parallel>], iteration_bounds = array<i64: 2>, scalar_prefetch = 0 : i64, scratch_operands = 0 : i64, tpu.core_type = #tpu.core_type<tc>, window_params = [{transform_indices = @transform_0, window_bounds = array<i64: 1, 3, 10, 64>}, {pipeline_mode = #tpu.pipeline_mode<synchronous>, transform_indices = @transform_1, window_bounds = array<i64: 576, 64>}, {pipeline_mode = #tpu.pipeline_mode<synchronous>, transform_indices = @transform_2, window_bounds = array<i64: 1, 64>}, {transform_indices = @transform_3, window_bounds = array<i64: 1, 1, 8, 64>}]} {
    %c0 = arith.constant 0 : index
    %c0_0 = arith.constant 0 : index
    %c0_1 = arith.constant 0 : index
    %c0_2 = arith.constant 0 : index
    %0 = vector.load %arg1[%c0, %c0_0, %c0_1, %c0_2] : memref<1x3x10x64xbf16, #tpu.memory_space<vmem>>, vector<1x1x8x64xbf16>
    %c0_3 = arith.constant 0 : index
    %c0_4 = arith.constant 0 : index
    %c1 = arith.constant 1 : index
    %c0_5 = arith.constant 0 : index
    %1 = vector.load %arg1[%c0_3, %c0_4, %c1, %c0_5] : memref<1x3x10x64xbf16, #tpu.memory_space<vmem>>, vector<1x1x8x64xbf16>
    %c0_6 = arith.constant 0 : index
    %c0_7 = arith.constant 0 : index
    %c2 = arith.constant 2 : index
    %c0_8 = arith.constant 0 : index
    %2 = vector.load %arg1[%c0_6, %c0_7, %c2, %c0_8] : memref<1x3x10x64xbf16, #tpu.memory_space<vmem>>, vector<1x1x8x64xbf16>
    %c0_9 = arith.constant 0 : index
    %c1_10 = arith.constant 1 : index
    %c0_11 = arith.constant 0 : index
    %c0_12 = arith.constant 0 : index
    %3 = vector.load %arg1[%c0_9, %c1_10, %c0_11, %c0_12] : memref<1x3x10x64xbf16, #tpu.memory_space<vmem>>, vector<1x1x8x64xbf16>
    %c0_13 = arith.constant 0 : index
    %c1_14 = arith.constant 1 : index
    %c1_15 = arith.constant 1 : index
    %c0_16 = arith.constant 0 : index
    %4 = vector.load %arg1[%c0_13, %c1_14, %c1_15, %c0_16] : memref<1x3x10x64xbf16, #tpu.memory_space<vmem>>, vector<1x1x8x64xbf16>
    %c0_17 = arith.constant 0 : index
    %c1_18 = arith.constant 1 : index
    %c2_19 = arith.constant 2 : index
    %c0_20 = arith.constant 0 : index
    %5 = vector.load %arg1[%c0_17, %c1_18, %c2_19, %c0_20] : memref<1x3x10x64xbf16, #tpu.memory_space<vmem>>, vector<1x1x8x64xbf16>
    %c0_21 = arith.constant 0 : index
    %c2_22 = arith.constant 2 : index
    %c0_23 = arith.constant 0 : index
    %c0_24 = arith.constant 0 : index
    %6 = vector.load %arg1[%c0_21, %c2_22, %c0_23, %c0_24] : memref<1x3x10x64xbf16, #tpu.memory_space<vmem>>, vector<1x1x8x64xbf16>
    %c0_25 = arith.constant 0 : index
    %c2_26 = arith.constant 2 : index
    %c1_27 = arith.constant 1 : index
    %c0_28 = arith.constant 0 : index
    %7 = vector.load %arg1[%c0_25, %c2_26, %c1_27, %c0_28] : memref<1x3x10x64xbf16, #tpu.memory_space<vmem>>, vector<1x1x8x64xbf16>
    %c0_29 = arith.constant 0 : index
    %c2_30 = arith.constant 2 : index
    %c2_31 = arith.constant 2 : index
    %c0_32 = arith.constant 0 : index
    %8 = vector.load %arg1[%c0_29, %c2_30, %c2_31, %c0_32] : memref<1x3x10x64xbf16, #tpu.memory_space<vmem>>, vector<1x1x8x64xbf16>
    %9 = tpu.concatenate %0, %1, %2, %3, %4, %5, %6, %7, %8 in 3 : vector<1x1x8x64xbf16>, vector<1x1x8x64xbf16>, vector<1x1x8x64xbf16>, vector<1x1x8x64xbf16>, vector<1x1x8x64xbf16>, vector<1x1x8x64xbf16>, vector<1x1x8x64xbf16>, vector<1x1x8x64xbf16>, vector<1x1x8x64xbf16> -> vector<1x1x8x576xbf16>
    %10 = vector.shape_cast %9 : vector<1x1x8x576xbf16> to vector<8x576xbf16>
    %c0_33 = arith.constant 0 : index
    %c0_34 = arith.constant 0 : index
    %11 = vector.load %arg2[%c0_33, %c0_34] : memref<576x64xbf16, #tpu.memory_space<vmem>>, vector<576x64xbf16>
    %cst = arith.constant dense<0.000000e+00> : vector<8x64xf32>
    %12 = tpu.matmul %10, %11, %cst {dimension_numbers = #tpu.dot_dimension_numbers<[1], [0], [0], [1], [0, 0, 1, 1], [], []>} : vector<8x576xbf16>, vector<576x64xbf16>, vector<8x64xf32> -> vector<8x64xf32>
    %c0_35 = arith.constant 0 : index
    %c0_36 = arith.constant 0 : index
    %13 = vector.load %arg3[%c0_35, %c0_36] : memref<1x64xf32, #tpu.memory_space<vmem>>, vector<1x64xf32>
    %14 = vector.broadcast %13 : vector<1x64xf32> to vector<8x64xf32>
    %15 = arith.addf %12, %14 : vector<8x64xf32>
    %cst_37 = arith.constant 0.000000e+00 : f32
    %16 = vector.broadcast %cst_37 : f32 to vector<8x64xf32>
    %17 = arith.maximumf %15, %16 : vector<8x64xf32>
    %18 = vector.shape_cast %17 : vector<8x64xf32> to vector<1x1x8x64xf32>
    %19 = arith.truncf %18 : vector<1x1x8x64xf32> to vector<1x1x8x64xbf16>
    %c0_38 = arith.constant 0 : index
    %c0_39 = arith.constant 0 : index
    %c0_40 = arith.constant 0 : index
    %c0_41 = arith.constant 0 : index
    %20 = vector.load %arg4[%c0_38, %c0_39, %c0_40, %c0_41] : memref<1x1x8x64xbf16, #tpu.memory_space<vmem>>, vector<1x1x8x64xbf16>
    tpu.vector_store %arg4[%c0_38, %c0_39, %c0_40, %c0_41], %19 {strides = array<i32>} : memref<1x1x8x64xbf16, #tpu.memory_space<vmem>>, vector<1x1x8x64xbf16>,
    return
  }
  func.func @transform_0(%arg0: i32) -> (i32, i32, i32, i32) {
    %c0_i32 = arith.constant 0 : i32
    %c0_i32_0 = arith.constant 0 : i32
    %c0_i32_1 = arith.constant 0 : i32
    %c0_i32_2 = arith.constant 0 : i32
    return %arg0, %c0_i32, %c0_i32_0, %c0_i32_1 : i32, i32, i32, i32
  }
  func.func @transform_1(%arg0: i32) -> (i32, i32) {
    %c0_i32 = arith.constant 0 : i32
    %c0_i32_0 = arith.constant 0 : i32
    %c0_i32_1 = arith.constant 0 : i32
    return %c0_i32, %c0_i32_0 : i32, i32
  }
  func.func @transform_2(%arg0: i32) -> (i32, i32) {
    %c0_i32 = arith.constant 0 : i32
    %c0_i32_0 = arith.constant 0 : i32
    %c0_i32_1 = arith.constant 0 : i32
    return %c0_i32, %c0_i32_0 : i32, i32
  }
  func.func @transform_3(%arg0: i32) -> (i32, i32, i32, i32) {
    %c0_i32 = arith.constant 0 : i32
    %c0_i32_0 = arith.constant 0 : i32
    %c0_i32_1 = arith.constant 0 : i32
    %c0_i32_2 = arith.constant 0 : i32
    return %arg0, %c0_i32, %c0_i32_0, %c0_i32_1 : i32, i32, i32, i32
  }
}

module attributes {stable_mosaic.version = 11 : i64} {
  func.func @_fused_mlp_kernel(%arg0: i32, %arg1: memref<8x64xbf16, #tpu.memory_space<vmem>>, %arg2: memref<64x512xbf16, #tpu.memory_space<vmem>>, %arg3: memref<1x512xf32, #tpu.memory_space<vmem>>, %arg4: memref<512x6xbf16, #tpu.memory_space<vmem>>, %arg5: memref<1x6xf32, #tpu.memory_space<vmem>>, %arg6: memref<8x6xf32, #tpu.memory_space<vmem>>) attributes {dimension_semantics = [#tpu.dimension_semantics<parallel>], iteration_bounds = array<i64: 1>, scalar_prefetch = 0 : i64, scratch_operands = 0 : i64, tpu.core_type = #tpu.core_type<tc>, window_params = [{transform_indices = @transform_0, window_bounds = array<i64: 8, 64>}, {pipeline_mode = #tpu.pipeline_mode<synchronous>, transform_indices = @transform_1, window_bounds = array<i64: 64, 512>}, {pipeline_mode = #tpu.pipeline_mode<synchronous>, transform_indices = @transform_2, window_bounds = array<i64: 1, 512>}, {pipeline_mode = #tpu.pipeline_mode<synchronous>, transform_indices = @transform_3, window_bounds = array<i64: 512, 6>}, {pipeline_mode = #tpu.pipeline_mode<synchronous>, transform_indices = @transform_4, window_bounds = array<i64: 1, 6>}, {transform_indices = @transform_5, window_bounds = array<i64: 8, 6>}]} {
    %c0 = arith.constant 0 : index
    %c0_0 = arith.constant 0 : index
    %0 = vector.load %arg1[%c0, %c0_0] : memref<8x64xbf16, #tpu.memory_space<vmem>>, vector<8x64xbf16>
    %cst = arith.constant 0.000000e+00 : f32
    %1 = vector.broadcast %cst : f32 to vector<8x6xf32>
    %c0_1 = arith.constant 0 : index
    %c0_2 = arith.constant 0 : index
    %2 = vector.load %arg2[%c0_1, %c0_2] : memref<64x512xbf16, #tpu.memory_space<vmem>>, vector<64x128xbf16>
    %cst_3 = arith.constant dense<0.000000e+00> : vector<8x128xf32>
    %3 = tpu.matmul %0, %2, %cst_3 {dimension_numbers = #tpu.dot_dimension_numbers<[1], [0], [0], [1], [0, 0, 1, 1], [], []>} : vector<8x64xbf16>, vector<64x128xbf16>, vector<8x128xf32> -> vector<8x128xf32>
    %c0_4 = arith.constant 0 : index
    %c0_5 = arith.constant 0 : index
    %4 = vector.load %arg3[%c0_4, %c0_5] : memref<1x512xf32, #tpu.memory_space<vmem>>, vector<1x128xf32>
    %5 = vector.broadcast %4 : vector<1x128xf32> to vector<8x128xf32>
    %6 = arith.addf %3, %5 : vector<8x128xf32>
    %cst_6 = arith.constant 0.000000e+00 : f32
    %7 = vector.broadcast %cst_6 : f32 to vector<8x128xf32>
    %8 = arith.maximumf %6, %7 : vector<8x128xf32>
    %9 = arith.truncf %8 : vector<8x128xf32> to vector<8x128xbf16>
    %c0_7 = arith.constant 0 : index
    %c0_8 = arith.constant 0 : index
    %10 = vector.load %arg4[%c0_7, %c0_8] : memref<512x6xbf16, #tpu.memory_space<vmem>>, vector<128x6xbf16>
    %cst_9 = arith.constant dense<0.000000e+00> : vector<8x6xf32>
    %11 = tpu.matmul %9, %10, %cst_9 {dimension_numbers = #tpu.dot_dimension_numbers<[1], [0], [0], [1], [0, 0, 1, 1], [], []>} : vector<8x128xbf16>, vector<128x6xbf16>, vector<8x6xf32> -> vector<8x6xf32>
    %12 = arith.addf %1, %11 : vector<8x6xf32>
    %c0_10 = arith.constant 0 : index
    %c128 = arith.constant 128 : index
    %13 = vector.load %arg2[%c0_10, %c128] : memref<64x512xbf16, #tpu.memory_space<vmem>>, vector<64x128xbf16>
    %cst_11 = arith.constant dense<0.000000e+00> : vector<8x128xf32>
    %14 = tpu.matmul %0, %13, %cst_11 {dimension_numbers = #tpu.dot_dimension_numbers<[1], [0], [0], [1], [0, 0, 1, 1], [], []>} : vector<8x64xbf16>, vector<64x128xbf16>, vector<8x128xf32> -> vector<8x128xf32>
    %c0_12 = arith.constant 0 : index
    %c128_13 = arith.constant 128 : index
    %15 = vector.load %arg3[%c0_12, %c128_13] : memref<1x512xf32, #tpu.memory_space<vmem>>, vector<1x128xf32>
    %16 = vector.broadcast %15 : vector<1x128xf32> to vector<8x128xf32>
    %17 = arith.addf %14, %16 : vector<8x128xf32>
    %cst_14 = arith.constant 0.000000e+00 : f32
    %18 = vector.broadcast %cst_14 : f32 to vector<8x128xf32>
    %19 = arith.maximumf %17, %18 : vector<8x128xf32>
    %20 = arith.truncf %19 : vector<8x128xf32> to vector<8x128xbf16>
    %c128_15 = arith.constant 128 : index
    %c0_16 = arith.constant 0 : index
    %21 = vector.load %arg4[%c128_15, %c0_16] : memref<512x6xbf16, #tpu.memory_space<vmem>>, vector<128x6xbf16>
    %cst_17 = arith.constant dense<0.000000e+00> : vector<8x6xf32>
    %22 = tpu.matmul %20, %21, %cst_17 {dimension_numbers = #tpu.dot_dimension_numbers<[1], [0], [0], [1], [0, 0, 1, 1], [], []>} : vector<8x128xbf16>, vector<128x6xbf16>, vector<8x6xf32> -> vector<8x6xf32>
    %23 = arith.addf %12, %22 : vector<8x6xf32>
    %c0_18 = arith.constant 0 : index
    %c256 = arith.constant 256 : index
    %24 = vector.load %arg2[%c0_18, %c256] : memref<64x512xbf16, #tpu.memory_space<vmem>>, vector<64x128xbf16>
    %cst_19 = arith.constant dense<0.000000e+00> : vector<8x128xf32>
    %25 = tpu.matmul %0, %24, %cst_19 {dimension_numbers = #tpu.dot_dimension_numbers<[1], [0], [0], [1], [0, 0, 1, 1], [], []>} : vector<8x64xbf16>, vector<64x128xbf16>, vector<8x128xf32> -> vector<8x128xf32>
    %c0_20 = arith.constant 0 : index
    %c256_21 = arith.constant 256 : index
    %26 = vector.load %arg3[%c0_20, %c256_21] : memref<1x512xf32, #tpu.memory_space<vmem>>, vector<1x128xf32>
    %27 = vector.broadcast %26 : vector<1x128xf32> to vector<8x128xf32>
    %28 = arith.addf %25, %27 : vector<8x128xf32>
    %cst_22 = arith.constant 0.000000e+00 : f32
    %29 = vector.broadcast %cst_22 : f32 to vector<8x128xf32>
    %30 = arith.maximumf %28, %29 : vector<8x128xf32>
    %31 = arith.truncf %30 : vector<8x128xf32> to vector<8x128xbf16>
    %c256_23 = arith.constant 256 : index
    %c0_24 = arith.constant 0 : index
    %32 = vector.load %arg4[%c256_23, %c0_24] : memref<512x6xbf16, #tpu.memory_space<vmem>>, vector<128x6xbf16>
    %cst_25 = arith.constant dense<0.000000e+00> : vector<8x6xf32>
    %33 = tpu.matmul %31, %32, %cst_25 {dimension_numbers = #tpu.dot_dimension_numbers<[1], [0], [0], [1], [0, 0, 1, 1], [], []>} : vector<8x128xbf16>, vector<128x6xbf16>, vector<8x6xf32> -> vector<8x6xf32>
    %34 = arith.addf %23, %33 : vector<8x6xf32>
    %c0_26 = arith.constant 0 : index
    %c384 = arith.constant 384 : index
    %35 = vector.load %arg2[%c0_26, %c384] : memref<64x512xbf16, #tpu.memory_space<vmem>>, vector<64x128xbf16>
    %cst_27 = arith.constant dense<0.000000e+00> : vector<8x128xf32>
    %36 = tpu.matmul %0, %35, %cst_27 {dimension_numbers = #tpu.dot_dimension_numbers<[1], [0], [0], [1], [0, 0, 1, 1], [], []>} : vector<8x64xbf16>, vector<64x128xbf16>, vector<8x128xf32> -> vector<8x128xf32>
    %c0_28 = arith.constant 0 : index
    %c384_29 = arith.constant 384 : index
    %37 = vector.load %arg3[%c0_28, %c384_29] : memref<1x512xf32, #tpu.memory_space<vmem>>, vector<1x128xf32>
    %38 = vector.broadcast %37 : vector<1x128xf32> to vector<8x128xf32>
    %39 = arith.addf %36, %38 : vector<8x128xf32>
    %cst_30 = arith.constant 0.000000e+00 : f32
    %40 = vector.broadcast %cst_30 : f32 to vector<8x128xf32>
    %41 = arith.maximumf %39, %40 : vector<8x128xf32>
    %42 = arith.truncf %41 : vector<8x128xf32> to vector<8x128xbf16>
    %c384_31 = arith.constant 384 : index
    %c0_32 = arith.constant 0 : index
    %43 = vector.load %arg4[%c384_31, %c0_32] : memref<512x6xbf16, #tpu.memory_space<vmem>>, vector<128x6xbf16>
    %cst_33 = arith.constant dense<0.000000e+00> : vector<8x6xf32>
    %44 = tpu.matmul %42, %43, %cst_33 {dimension_numbers = #tpu.dot_dimension_numbers<[1], [0], [0], [1], [0, 0, 1, 1], [], []>} : vector<8x128xbf16>, vector<128x6xbf16>, vector<8x6xf32> -> vector<8x6xf32>
    %45 = arith.addf %34, %44 : vector<8x6xf32>
    %c0_34 = arith.constant 0 : index
    %c0_35 = arith.constant 0 : index
    %46 = vector.load %arg5[%c0_34, %c0_35] : memref<1x6xf32, #tpu.memory_space<vmem>>, vector<1x6xf32>
    %47 = vector.broadcast %46 : vector<1x6xf32> to vector<8x6xf32>
    %48 = arith.addf %45, %47 : vector<8x6xf32>
    %c0_36 = arith.constant 0 : index
    %c0_37 = arith.constant 0 : index
    %49 = vector.load %arg6[%c0_36, %c0_37] : memref<8x6xf32, #tpu.memory_space<vmem>>, vector<8x6xf32>
    tpu.vector_store %arg6[%c0_36, %c0_37], %48 {strides = array<i32>} : memref<8x6xf32, #tpu.memory_space<vmem>>, vector<8x6xf32>,
    return
  }
  func.func @transform_0(%arg0: i32) -> (i32, i32) {
    %c0_i32 = arith.constant 0 : i32
    %c0_i32_0 = arith.constant 0 : i32
    return %arg0, %c0_i32 : i32, i32
  }
  func.func @transform_1(%arg0: i32) -> (i32, i32) {
    %c0_i32 = arith.constant 0 : i32
    %c0_i32_0 = arith.constant 0 : i32
    %c0_i32_1 = arith.constant 0 : i32
    return %c0_i32, %c0_i32_0 : i32, i32
  }
  func.func @transform_2(%arg0: i32) -> (i32, i32) {
    %c0_i32 = arith.constant 0 : i32
    %c0_i32_0 = arith.constant 0 : i32
    %c0_i32_1 = arith.constant 0 : i32
    return %c0_i32, %c0_i32_0 : i32, i32
  }
  func.func @transform_3(%arg0: i32) -> (i32, i32) {
    %c0_i32 = arith.constant 0 : i32
    %c0_i32_0 = arith.constant 0 : i32
    %c0_i32_1 = arith.constant 0 : i32
    return %c0_i32, %c0_i32_0 : i32, i32
  }
  func.func @transform_4(%arg0: i32) -> (i32, i32) {
    %c0_i32 = arith.constant 0 : i32
    %c0_i32_0 = arith.constant 0 : i32
    %c0_i32_1 = arith.constant 0 : i32
    return %c0_i32, %c0_i32_0 : i32, i32
  }
  func.func @transform_5(%arg0: i32) -> (i32, i32) {
    %c0_i32 = arith.constant 0 : i32
    %c0_i32_0 = arith.constant 0 : i32
    return %arg0, %c0_i32 : i32, i32
  }
}

</mosaic_0001>

<bundles_post_ra>
// kernel: dqn_forward.4
= control target key start
LH: loop header
LB: loop body
LE: loop exit
PB: predicated region body
PF: predicated region fallthrough
CT: control target
= control target key end

     0   :  { %s1001_s12 = smov 0   ;;  %s1229_s0 = inlined_call_operand.vmem [shape: bf16[2,9,9,64], index: 0, kind: input, shape index: {}]   ;;  %s1230_s1 = inlined_call_operand.vmem [shape: bf16[256,32], index: 1, kind: input, shape index: {}]   ;;  %s1231_s2 = inlined_call_operand.vmem [shape: f32[1,32], index: 2, kind: input, shape index: {}]   ;;  %s1232_s3 = inlined_call_operand.vmem [shape: bf16[2,8,8,32], index: 3, kind: output, shape index: {}]  }
   0x1 LB: > { %s806_s13 = sadd.s32 4294967295, %s978_s12   ;;  %p810_p0 = scmp.ge.s32.totalorder %s978_s12, 1  ;;  %s978_s12 = sphi %s1001_s12, %s13_s12  }
   0x2   : > { %p137_p1 = scmp.lt.s32.totalorder %s978_s12, 3 }
   0x4   : > { %p138_p2 = pnand %p810_p0, %p137_p1 }
   0x5   : > { %p161_p3 = scmp.lt.s32.totalorder (!%p138_p2), %s806_s13, 1  ;;  %v956_v0 = vld [vmem:[%s1230_s1 + $0x40] sm:$0xff] (!%p138_p2)   ;;  %v958_v2 = vld [vmem:[%s1230_s1 + $0x48] sm:$0xff] (!%p138_p2)   ;;  %v960_v4 = vld [vmem:[%s1230_s1 + $0x50] sm:$0xff] (!%p138_p2)   ;;  %s980_s7 = smov (!%p138_p2), 64   ;;  %vm429_vm0 = vcmask (!%p138_p2), 523264  }
   0x6   : > { %141 = sbr.rel (%p138_p2) target bundleno = 397 (0x18d), region = 32  ;;  %v957_v1 = vld [vmem:[%s1230_s1] sm:$0xff] (!%p138_p2)   ;;  %874 = vmatprep.subr.bf16.mxu0 (!%p138_p2), %v956_v0  ;;  %914 = vmatprep.subr.bf16.mxu1 (!%p138_p2), %v956_v0  ;;  %v959_v3 = vld [vmem:[%s1230_s1 + $0x8] sm:$0xff] (!%p138_p2)   ;;  %v961_v5 = vld [vmem:[%s1230_s1 + $0x10] sm:$0xff] (!%p138_p2)   ;;  %vm742_vm1 = vcmask (!%p138_p2), 257024  }
   0x7   : > { %875 = vmatpush3.bf16.msra.mxu0 (!%p138_p2), %v957_v1  ;;  %922 = vmatpush3.bf16.msra.mxu1 (!%p138_p2), %v957_v1  ;;  %v962_v33 = vld [vmem:[%s1230_s1 + $0x58] sm:$0xff] (!%p138_p2)   ;;  %v964_v56 = vld [vmem:[%s1230_s1 + $0x60] sm:$0xff] (!%p138_p2)  }
   0x8   : > { %876 = vmatprep.subr.bf16.mxu0 (!%p138_p2), %v958_v2  ;;  %915 = vmatprep.subr.bf16.mxu1 (!%p138_p2), %v958_v2  ;;  %v963_v44 = vld [vmem:[%s1230_s1 + $0x18] sm:$0xff] (!%p138_p2)   ;;  %v965_v63 = vld [vmem:[%s1230_s1 + $0x20] sm:$0xff] (!%p138_p2)   ;;  %v966_v2 = vld [vmem:[%s1230_s1 + $0x68] sm:$0xff] (!%p138_p2)  }
   0xb   : > { %877 = vmatpush3.bf16.msra.mxu0 (!%p138_p2), %v959_v3  ;;  %923 = vmatpush3.bf16.msra.mxu1 (!%p138_p2), %v959_v3 }
   0xc   : > { %878 = vmatprep.subr.bf16.mxu0 (!%p138_p2), %v960_v4  ;;  %916 = vmatprep.subr.bf16.mxu1 (!%p138_p2), %v960_v4 }
   0xd   : > { %s1234_s13 = smov (!%p161_p3, %s806_s13), 1 }
   0xe   : > { %s930_s20 = smul.u32 72, %s1234_s13  ;;  %s873_s28 = sshll.u32 %s1234_s13, 5 }
   0xf   : > { %879 = vmatpush3.bf16.msra.mxu0 %v961_v5  ;;  %924 = vmatpush3.bf16.msra.mxu1 %v961_v5  ;;  %s1208_s4 = scalar_lea.vmem %s1232_s3, %s873_s28 }
  0x10   : > { %s1030_s27 = scalar_lea.vmem %s1229_s0, %s930_s20  ;;  %880 = vmatprep.subr.bf16.mxu0 %v962_v33  ;;  %917 = vmatprep.subr.bf16.mxu1 %v962_v33 }
  0x11   : > { %v1036_v6 = vld [vmem:[%s1030_s27 + $0x28] sm:$0xf]  ;;  %v826_v7 = vld [vmem:[%s1030_s27 + $0x2c] sm:$0x1]  ;;  %v1045_v11 = vld [vmem:[%s1030_s27 + $0x30] sm:$0xf] }
  0x12   : > { %v1040_v8 = vld [vmem:[%s1030_s27 + $0x8] sm:$0xf]  ;;  %v842_v9 = vcombine.low %v1036_v6, %v826_v7  ;;  %v822_v10 = vld [vmem:[%s1030_s27 + $0xc] sm:$0x1]  ;;  %v827_v12 = vld [vmem:[%s1030_s27 + $0x34] sm:$0x1] }
  0x13   : > { %v838_v13 = vcombine.low %v1040_v8, %v822_v10  ;;  %v843_v14 = vcombine.low %v1045_v11, %v827_v12  ;;  %v1051_v15 = vld [vmem:[%s1030_s27 + $0x10] sm:$0xf]  ;;  %v823_v16 = vld [vmem:[%s1030_s27 + $0x14] sm:$0x1]  ;;  %v1055_v17 = vld [vmem:[%s1030_s27 + $0x8] sm:$0xf]  ;;  %881 = vmatpush3.bf16.msra.mxu0 %v963_v44  ;;  %925 = vmatpush3.bf16.msra.mxu1 %v963_v44 }
  0x14   : > { %v386_v18 = vshrl.u32 %v842_v9, 16  ;;  %v388_v19 = vshll.u32 %v842_v9, 16  ;;  %v839_v20 = vcombine.low %v1051_v15, %v823_v16  ;;  %v181_v21 = vld [vmem:[%s1030_s27 + $0xc] sm:$0x1]  ;;  %v1060_v22 = vld [vmem:[%s1030_s27] sm:$0xf]  ;;  %882 = vmatprep.subr.bf16.mxu0 %v964_v56  ;;  %918 = vmatprep.subr.bf16.mxu1 %v964_v56 }
  0x15   : > { %v358_v23 = vshrl.u32 %v838_v13, 16  ;;  %v360_v24 = vshll.u32 %v838_v13, 16  ;;  %v393_v25 = vshrl.u32 %v843_v14, 16  ;;  %v395_v26 = vshll.u32 %v843_v14, 16  ;;  %v180_v27 = vld [vmem:[%s1030_s27 + $0x4] sm:$0x1] }
  0x16   : > { %v390_v28 = vrot.slane %v388_v19, 1  ;;  %v365_v29 = vshrl.u32 %v839_v20, 16  ;;  %v367_v30 = vshll.u32 %v839_v20, 16  ;;  %v831_v31 = vcombine.low %v1055_v17, %v181_v21  ;;  %v1065_v32 = vld [vmem:[%s1030_s27 + $0x28] sm:$0xf] }
  0x17   : > { %v362_v34 = vrot.slane %v360_v24, 1  ;;  %v397_v35 = vrot.slane %v395_v26, 1  ;;  %v830_v36 = vcombine.low %v1060_v22, %v180_v27  ;;  %v185_v37 = vld [vmem:[%s1030_s27 + $0x2c] sm:$0x1]  ;;  %v1073_v38 = vld [vmem:[%s1030_s27 + $0x20] sm:$0xf]  ;;  %883 = vmatpush3.bf16.msra.mxu0 %v965_v63  ;;  %926 = vmatpush3.bf16.msra.mxu1 %v965_v63 }
  0x18   : > { %v391_v39 = vor.u32 %v390_v28, %v386_v18  ;;  %v369_v40 = vrot.slane %v367_v30, 1  ;;  %v253_v41 = vshrl.u32 %v831_v31, 16  ;;  %v255_v42 = vshll.u32 %v831_v31, 16  ;;  %v184_v43 = vld [vmem:[%s1030_s27 + $0x24] sm:$0x1]  ;;  %v967_v18 = vld [vmem:[%s1230_s1 + $0x28] sm:$0xff]   ;;  %884 = vmatprep.subr.bf16.mxu0 %v966_v2  ;;  %919 = vmatprep.subr.bf16.mxu1 %v966_v2 }
  0x19   : > { %v363_v45 = vor.u32 %v362_v34, %v358_v23  ;;  %v246_v46 = vshrl.u32 %v830_v36, 16  ;;  %v248_v47 = vshll.u32 %v830_v36, 16  ;;  %v1080_v48 = vld [vmem:[%s1030_s27 + $0x20] sm:$0xf]  ;;  %v825_v49 = vld [vmem:[%s1030_s27 + $0x24] sm:$0x1]  ;;  %v398_v50 = vor.u32 %v397_v35, %v393_v25 }
  0x1a   : > { %421 = vrot.lane.b32.xlu1 %v391_v39, %s980_s7  ;;  %v257_v51 = vrot.slane %v255_v42, 1  ;;  %v835_v52 = vcombine.low %v1065_v32, %v185_v37  ;;  %v834_v53 = vcombine.low %v1073_v38, %v184_v43  ;;  %v1087_v54 = vld [vmem:[%s1030_s27 + $0x18] sm:$0xf]  ;;  %v824_v55 = vld [vmem:[%s1030_s27 + $0x1c] sm:$0x1]  ;;  %v370_v57 = vor.u32 %v369_v40, %v365_v29  ;;  %v968_v25 = vld [vmem:[%s1230_s1 + $0x70] sm:$0xff]  }
  0x1b   : > { %413 = vrot.lane.b32.xlu0 %v363_v45, %s980_s7  ;;  %v250_v58 = vrot.slane %v248_v47, 1  ;;  %v1095_v59 = vcombine.low %v1080_v48, %v825_v49  ;;  %v1098_v60 = vcombine.low %v1087_v54, %v824_v55  ;;  %v1101_v61 = vld [vmem:[%s1030_s27 + $0x40] sm:$0xf]  ;;  %v829_v62 = vld [vmem:[%s1030_s27 + $0x44] sm:$0x1]  ;;  %885 = vmatpush3.bf16.msra.mxu0 %v967_v18  ;;  %v970_v45 = vld [vmem:[%s1230_s1 + $0x78] sm:$0xff]  }
  0x1c   : > { %v283_v0 = vshll.u32 %v835_v52, 16  ;;  %v1108_v1 = vld [vmem:[%s1030_s27 + $0x38] sm:$0xf]  ;;  %v258_v3 = vor.u32 %v257_v51, %v253_v41  ;;  %v281_v4 = vshrl.u32 %v835_v52, 16  ;;  %v276_v5 = vshll.u32 %v834_v53, 16  ;;  %v969_v41 = vld [vmem:[%s1230_s1 + $0x30] sm:$0xff]   ;;  %886 = vmatprep.subr.bf16.mxu0 %v968_v25  ;;  %927 = vmatpush3.bf16.msra.mxu1 %v967_v18 }
  0x1d   : > { %v381_v7 = vshll.u32 %v1095_v59, 16  ;;  %v828_v9 = vld [vmem:[%s1030_s27 + $0x3c] sm:$0x1]  ;;  %v274_v12 = vshrl.u32 %v834_v53, 16  ;;  %v374_v13 = vshll.u32 %v1098_v60, 16  ;;  %v845_v14 = vcombine.low %v1101_v61, %v829_v62  ;;  %920 = vmatprep.subr.bf16.mxu1 %v968_v25 }
  0x1e   : > { %423 = vrot.lane.b32.xlu1 %v398_v50, %s980_s7  ;;  %v285_v10 = vrot.slane %v283_v0, 1  ;;  %v1119_v16 = vld [vmem:[%s1030_s27 + $0x18] sm:$0xf]  ;;  %v251_v19 = vor.u32 %v250_v58, %v246_v46  ;;  %v278_v20 = vrot.slane %v276_v5, 1  ;;  %v844_v21 = vcombine.low %v1108_v1, %v828_v9  ;;  %v183_v23 = vld [vmem:[%s1030_s27 + $0x1c] sm:$0x1] }
  0x1f   : > { %415 = vrot.lane.b32.xlu0 %v370_v57, %s980_s7  ;;  %v1128_v24 = vld [vmem:[%s1030_s27 + $0x10] sm:$0xf]  ;;  %v379_v26 = vshrl.u32 %v1095_v59, 16  ;;  %v372_v27 = vshrl.u32 %v1098_v60, 16  ;;  %v182_v28 = vld [vmem:[%s1030_s27 + $0x14] sm:$0x1]  ;;  %v833_v36 = vcombine.low %v1119_v16, %v183_v23  ;;  %887 = vmatpush3.bf16.msra.mxu0 %v969_v41 }
  0x20   : > { %v383_v29 = vrot.slane %v381_v7, 1  ;;  %v409_v30 = vshll.u32 %v845_v14, 16  ;;  %v1137_v31 = vld [vmem:[%s1030_s27 + $0x38] sm:$0xf]  ;;  %v187_v33 = vld [vmem:[%s1030_s27 + $0x3c] sm:$0x1]  ;;  %v286_v34 = vor.u32 %v285_v10, %v281_v4  ;;  %v832_v37 = vcombine.low %v1128_v24, %v182_v28  ;;  %888 = vmatprep.subr.bf16.mxu0 %v970_v45  ;;  %928 = vmatpush3.bf16.msra.mxu1 %v969_v41 }
  0x21   : > { %v402_v35 = vshll.u32 %v844_v21, 16  ;;  %v1144_v39 = vld [vmem:[%s1030_s27 + $0x30] sm:$0xf]  ;;  %v186_v40 = vld [vmem:[%s1030_s27 + $0x34] sm:$0x1]  ;;  %v279_v42 = vor.u32 %v278_v20, %v274_v12  ;;  %v376_v43 = vrot.slane %v374_v13, 1  ;;  %v837_v44 = vcombine.low %v1137_v31, %v187_v33  ;;  %921 = vmatprep.subr.bf16.mxu1 %v970_v45 }
  0x22   : > { %303 = vrot.lane.b32.xlu1 %v258_v3, %s980_s7  ;;  %v269_v46 = vshll.u32 %v833_v36, 16  ;;  %v836_v47 = vcombine.low %v1144_v39, %v186_v40  ;;  %v407_v49 = vshrl.u32 %v845_v14, 16  ;;  %v411_v50 = vrot.slane %v409_v30, 1  ;;  %v971_v58 = vld [vmem:[%s1230_s1 + $0x38] sm:$0xff]  }
  0x23   : > { %301 = vrot.lane.b32.xlu0 %v251_v19, %s980_s7  ;;  %v400_v51 = vshrl.u32 %v844_v21, 16  ;;  %v262_v52 = vshll.u32 %v832_v37, 16  ;;  %v384_v53 = vor.u32 %v383_v29, %v379_v26  ;;  %v404_v55 = vrot.slane %v402_v35, 1  ;;  %889 = vmatpush3.bf16.msra.mxu0 %v971_v58 }
  0x24   : > { %v267_v56 = vshrl.u32 %v833_v36, 16  ;;  %v260_v57 = vshrl.u32 %v832_v37, 16  ;;  %v377_v59 = vor.u32 %v376_v43, %v372_v27  ;;  %v271_v60 = vrot.slane %v269_v46, 1  ;;  %929 = vmatpush3.bf16.msra.mxu1 %v971_v58 }
  0x25   : > { %v297_v62 = vshll.u32 %v837_v44, 16  ;;  %v264_v63 = vrot.slane %v262_v52, 1  ;;  %v290_v0 = vshll.u32 %v836_v47, 16  ;;  %v412_v2 = vor.u32 %v411_v50, %v407_v49 }
  0x26   : > { %311 = vrot.lane.b32.xlu1 %v286_v34, %s980_s7  ;;  %v405_v3 = vor.u32 %v404_v55, %v400_v51  ;;  %v272_v4 = vor.u32 %v271_v60, %v267_v56  ;;  %v295_v5 = vshrl.u32 %v837_v44, 16  ;;  %v288_v10 = vshrl.u32 %v836_v47, 16 }
  0x27   : > { %309 = vrot.lane.b32.xlu0 %v279_v42, %s980_s7  ;;  %v299_v7 = vrot.slane %v297_v62, 1  ;;  %v265_v9 = vor.u32 %v264_v63, %v260_v57  ;;  %v292_v12 = vrot.slane %v290_v0, 1 }
  0x29   : > { %v300_v13 = vor.u32 %v299_v7, %v295_v5  ;;  %v293_v14 = vor.u32 %v292_v12, %v288_v10 }
  0x2a   : > { %419 = vrot.lane.b32.xlu1 %v384_v53, %s980_s7 }
  0x2b   : > { %417 = vrot.lane.b32.xlu0 %v377_v59, %s980_s7 }
  0x2e   : > { %427 = vrot.lane.b32.xlu1 %v412_v2, %s980_s7 }
  0x2f   : > { %425 = vrot.lane.b32.xlu0 %v405_v3, %s980_s7 }
  0x32   : > { %307 = vrot.lane.b32.xlu1 %v272_v4, %s980_s7 }
  0x33   : > { %305 = vrot.lane.b32.xlu0 %v265_v9, %s980_s7 }
  0x36   : > { %315 = vrot.lane.b32.xlu1 %v300_v13, %s980_s7 }
  0x37   : > { %313 = vrot.lane.b32.xlu0 %v293_v14, %s980_s7 }
  0x8c   : > { %v422_v18 = vpop.permute.xlu1 %421 }
  0x8d   : > { %v414_v19 = vpop.permute.xlu0 %413  ;;  %v468_v23 = vsel %vm429_vm0, %v1036_v6, %v422_v18 }
  0x8e   : > { %v456_v26 = vsel %vm429_vm0, %v1040_v8, %v414_v19 }
  0x90   : > { %v424_v20 = vpop.permute.xlu1 %423 }
  0x91   : > { %v416_v21 = vpop.permute.xlu0 %415  ;;  %v471_v25 = vsel %vm429_vm0, %v1045_v11, %v424_v20 }
  0x92   : > { %v459_v27 = vsel %vm429_vm0, %v1051_v15, %v416_v21  ;;  %v852_v28 = vcombine.low %v468_v23, %v471_v25 }
  0x93   : > { %v848_v29 = vcombine.low %v456_v26, %v459_v27 }
  0x94   : > { %709 = vmatprep.mubr.bf16.mxu1 %v852_v28  ;;  %v304_v30 = vpop.permute.xlu1 %303 }
  0x95   : > { %693 = vmatprep.mubr.bf16.mxu0 %v848_v29  ;;  %v435_v33 = vsel %vm429_vm0, %v1055_v17, %v304_v30  ;;  %v302_v34 = vpop.permute.xlu0 %301 }
  0x96   : > { %v432_v6 = vsel %vm429_vm0, %v1060_v22, %v302_v34 }
  0x97   : > { %v847_v35 = vcombine.low %v432_v6, %v435_v33 }
  0x98   : > { %v312_v11 = vpop.permute.xlu1 %311 }
  0x99   : > { %v447_v8 = vsel %vm429_vm0, %v1065_v32, %v312_v11  ;;  %694 = vmatmul.mubr.bf16.vlgmr.msra.gmra.mrb[0].mxu0 %v847_v35  ;;  %v310_v36 = vpop.permute.xlu0 %309 }
  0x9a   : > { %v444_v15 = vsel %vm429_vm0, %v1073_v38, %v310_v36 }
  0x9b   : > { %v851_v37 = vcombine.low %v444_v15, %v447_v8 }
  0x9c   : > { %v420_v40 = vpop.permute.xlu1 %419 }
  0x9d   : > { %v465_v41 = vsel %vm429_vm0, %v1080_v48, %v420_v40  ;;  %710 = vmatmul.mubr.bf16.vlgmr.msra.gmra.mrb[0].mxu1 %v851_v37  ;;  %v418_v17 = vpop.permute.xlu0 %417 }
  0x9e   : > { %v462_v22 = vsel %vm429_vm0, %v1087_v54, %v418_v17 }
  0x9f   : > { %v850_v42 = vcombine.low %v462_v22, %v465_v41 }
  0xa0   : > { %v428_v43 = vpop.permute.xlu1 %427 }
  0xa1   : > { %v477_v32 = vsel %vm429_vm0, %v1101_v61, %v428_v43  ;;  %701 = vmatprep.mubr.bf16.mxu0 %v850_v42  ;;  %v426_v44 = vpop.permute.xlu0 %425 }
  0xa2   : > { %v474_v38 = vsel %vm429_vm0, %v1108_v1, %v426_v44 }
  0xa3   : > { %v854_v45 = vcombine.low %v474_v38, %v477_v32 }
  0xa4   : > { %v308_v46 = vpop.permute.xlu1 %307 }
  0xa5   : > { %v441_v48 = vsel %vm429_vm0, %v1119_v16, %v308_v46  ;;  %717 = vmatprep.mubr.bf16.mxu1 %v854_v45  ;;  %v306_v47 = vpop.permute.xlu0 %305  ;;  %v846_v16 = vld [vmem:[%s1231_s2] ss:$0 sm:$0xff] }
  0xa6   : > { %v438_v54 = vsel %vm429_vm0, %v1128_v24, %v306_v47 }
  0xa7   : > { %v849_v49 = vcombine.low %v438_v54, %v441_v48 }
  0xa8   : > { %v316_v50 = vpop.permute.xlu1 %315 }
  0xa9   : > { %v453_v61 = vsel %vm429_vm0, %v1137_v31, %v316_v50  ;;  %702 = vmatmul.mubr.bf16.gmra.mrb[4].mxu0 %v849_v49  ;;  %v314_v51 = vpop.permute.xlu0 %313 }
  0xaa   : > { %v450_v1 = vsel %vm429_vm0, %v1144_v39, %v314_v51 }
  0xab   : > { %v853_v52 = vcombine.low %v450_v1, %v453_v61 }
  0xad   : > { %718 = vmatmul.mubr.bf16.gmra.mrb[4].mxu1 %v853_v52 }
 0x16c   : > { %v890_v53 = vpop.f32.mrb[0].mxu0 }
 0x16d   : > { %v891_v55 = vpop.f32.mrb[1].mxu0 }
 0x16e   : > { %v892_v56 = vadd.f32 %v891_v55, %v890_v53  ;;  %v893_v24 = vpop.f32.mrb[2].mxu0 }
 0x16f   : > { %v894_v57 = vpop.f32.mrb[3].mxu0 }
 0x170   : > { %v696_v58 = vadd.f32 %v892_v56, %v846_v16  ;;  %v895_v59 = vadd.f32 %v894_v57, %v893_v24  ;;  %v902_v31 = vpop.f32.mrb[0].mxu1 }
 0x171   : > { %v903_v60 = vpop.f32.mrb[1].mxu1 }
 0x172   : > { %v726_v62 = vmax.f32 %v696_v58, 0.0  ;;  %v699_v63 = vadd.f32 %v895_v59, %v846_v16  ;;  %v904_v0 = vadd.f32 %v903_v60, %v902_v31  ;;  %v905_v39 = vpop.f32.mrb[2].mxu1 }
 0x173   : > { %v906_v2 = vpop.f32.mrb[3].mxu1 }
 0x174   : > { %v734_v3 = vpack.c.bf16 %v726_v62, %v726_v62  ;;  %v727_v4 = vmax.f32 %v699_v63, 0.0  ;;  %v712_v5 = vadd.f32 %v904_v0, %v846_v16  ;;  %v907_v7 = vadd.f32 %v906_v2, %v905_v39 }
 0x176   : > { %743 = vst.msk [vmem:[%s1208_s4] sm:$0xf] %vm742_vm1, %v734_v3  ;;  %v735_v9 = vpack.c.bf16 %v727_v4, %v727_v4  ;;  %v730_v10 = vmax.f32 %v712_v5, 0.0  ;;  %v715_v12 = vadd.f32 %v907_v7, %v846_v16 }
 0x178   : > { %744 = vst.msk [vmem:[%s1208_s4 + $0x4] sm:$0xf] %vm742_vm1, %v735_v9  ;;  %v738_v13 = vpack.c.bf16 %v730_v10, %v730_v10  ;;  %v731_v14 = vmax.f32 %v715_v12, 0.0 }
 0x17a   : > { %747 = vst.msk [vmem:[%s1208_s4 + $0x10] sm:$0xf] %vm742_vm1, %v738_v13  ;;  %v739_v18 = vpack.c.bf16 %v731_v14, %v731_v14 }
 0x17c   : > { %748 = vst.msk [vmem:[%s1208_s4 + $0x14] sm:$0xf] %vm742_vm1, %v739_v18  ;;  %v896_v19 = vpop.f32.mrb[4].mxu0 }
 0x17d   : > { %v897_v20 = vpop.f32.mrb[5].mxu0 }
 0x17e   : > { %v898_v21 = vadd.f32 %v897_v20, %v896_v19  ;;  %v899_v23 = vpop.f32.mrb[6].mxu0 }
 0x17f   : > { %v900_v25 = vpop.f32.mrb[7].mxu0 }
 0x180   : > { %v704_v26 = vadd.f32 %v898_v21, %v846_v16  ;;  %v901_v27 = vadd.f32 %v900_v25, %v899_v23  ;;  %v908_v28 = vpop.f32.mrb[4].mxu1 }
 0x181   : > { %v909_v29 = vpop.f32.mrb[5].mxu1 }
 0x182   : > { %v728_v30 = vmax.f32 %v704_v26, 0.0  ;;  %v707_v33 = vadd.f32 %v901_v27, %v846_v16  ;;  %v910_v34 = vadd.f32 %v909_v29, %v908_v28  ;;  %v911_v6 = vpop.f32.mrb[6].mxu1 }
 0x183   : > { %v912_v35 = vpop.f32.mrb[7].mxu1 }
 0x184   : > { %v736_v11 = vpack.c.bf16 %v728_v30, %v728_v30  ;;  %v729_v8 = vmax.f32 %v707_v33, 0.0  ;;  %v720_v36 = vadd.f32 %v910_v34, %v846_v16  ;;  %v913_v15 = vadd.f32 %v912_v35, %v911_v6 }
 0x186   : > { %745 = vst.msk [vmem:[%s1208_s4 + $0x8] sm:$0xf] %vm742_vm1, %v736_v11  ;;  %v737_v37 = vpack.c.bf16 %v729_v8, %v729_v8  ;;  %v732_v40 = vmax.f32 %v720_v36, 0.0  ;;  %v723_v41 = vadd.f32 %v913_v15, %v846_v16 }
 0x188   : > { %746 = vst.msk [vmem:[%s1208_s4 + $0xc] sm:$0xf] %vm742_vm1, %v737_v37  ;;  %v740_v17 = vpack.c.bf16 %v732_v40, %v732_v40  ;;  %v733_v22 = vmax.f32 %v723_v41, 0.0 }
 0x18a   : > { %749 = vst.msk [vmem:[%s1208_s4 + $0x18] sm:$0xf] %vm742_vm1, %v740_v17  ;;  %v741_v42 = vpack.c.bf16 %v733_v22, %v733_v22 }
 0x18c   : > { %750 = vst.msk [vmem:[%s1208_s4 + $0x1c] sm:$0xf] %vm742_vm1, %v741_v42 }
 0x18d PF: > { %s13_s12 = sadd.s32 1, %s978_s12  }
 0x18e   : > { %p10_p4 = scmp.ge.s32.totalorder %s13_s12, 4  }
 0x190   :  { %12 = sbr.rel (!%p10_p4) target bundleno = 1 (0x1), region = 63 }

// kernel: dqn_forward.5
= control target key start
LH: loop header
LB: loop body
LE: loop exit
PB: predicated region body
PF: predicated region fallthrough
CT: control target
= control target key end

     0   :  { %s902_s12 = smov 0   ;;  %s1029_s0 = inlined_call_operand.vmem [shape: bf16[2,4,9,128], index: 0, kind: input, shape index: {}]   ;;  %s1030_s1 = inlined_call_operand.vmem [shape: bf16[512,64], index: 1, kind: input, shape index: {}]   ;;  %s1031_s2 = inlined_call_operand.vmem [shape: f32[1,64], index: 2, kind: input, shape index: {}]   ;;  %s1032_s3 = inlined_call_operand.vmem [shape: bf16[2,3,8,64], index: 3, kind: output, shape index: {}]  }
   0x1 LB: > { %s703_s13 = sadd.s32 4294967295, %s880_s12   ;;  %p707_p0 = scmp.ge.s32.totalorder %s880_s12, 1  ;;  %s880_s12 = sphi %s902_s12, %s13_s12  }
   0x2   : > { %p137_p1 = scmp.lt.s32.totalorder %s880_s12, 3 }
   0x4   : > { %p138_p2 = pnand %p707_p0, %p137_p1 }
   0x5   : > { %v832_v0 = vld [vmem:[%s1030_s1 + $0x40] sm:$0xff] (!%p138_p2)   ;;  %v836_v4 = vld [vmem:[%s1030_s1 + $0x48] sm:$0xff] (!%p138_p2)   ;;  %v840_v8 = vld [vmem:[%s1030_s1 + $0x50] sm:$0xff] (!%p138_p2)   ;;  %p161_p3 = scmp.lt.s32.totalorder (!%p138_p2), %s703_s13, 1  ;;  %vm644_vm0 = vcmask (!%p138_p2), 519168  }
   0x6   : > { %141 = sbr.rel (%p138_p2) target bundleno = 271 (0x10f), region = 32  ;;  %v833_v1 = vld [vmem:[%s1030_s1 + $0xc0] sm:$0xff] (!%p138_p2)   ;;  %767 = vmatprep.subr.bf16.mxu0 (!%p138_p2), %v832_v0  ;;  %v837_v5 = vld [vmem:[%s1030_s1 + $0xc8] sm:$0xff] (!%p138_p2)   ;;  %v841_v9 = vld [vmem:[%s1030_s1 + $0xd0] sm:$0xff] (!%p138_p2)  }
   0x7   : > { %v834_v2 = vld [vmem:[%s1030_s1] sm:$0xff] (!%p138_p2)   ;;  %795 = vmatprep.subr.bf16.mxu1 (!%p138_p2), %v833_v1  ;;  %v838_v6 = vld [vmem:[%s1030_s1 + $0x8] sm:$0xff] (!%p138_p2)   ;;  %v842_v10 = vld [vmem:[%s1030_s1 + $0x10] sm:$0xff] (!%p138_p2)  }
   0x8   : > { %v835_v3 = vld [vmem:[%s1030_s1 + $0x80] sm:$0xff] (!%p138_p2)   ;;  %768 = vmatpush3.bf16.msra.mxu0 (!%p138_p2), %v834_v2  ;;  %v839_v7 = vld [vmem:[%s1030_s1 + $0x88] sm:$0xff] (!%p138_p2)   ;;  %v843_v11 = vld [vmem:[%s1030_s1 + $0x90] sm:$0xff] (!%p138_p2)  }
   0x9   : > { %796 = vmatpush3.bf16.msra.mxu1 (!%p138_p2), %v835_v3  ;;  %769 = vmatprep.subr.bf16.mxu0 (!%p138_p2), %v836_v4  ;;  %v844_v12 = vld [vmem:[%s1030_s1 + $0x58] sm:$0xff] (!%p138_p2)   ;;  %v848_v16 = vld [vmem:[%s1030_s1 + $0x60] sm:$0xff] (!%p138_p2)   ;;  %v852_v20 = vld [vmem:[%s1030_s1 + $0x68] sm:$0xff] (!%p138_p2)  }
   0xa   : > { %797 = vmatprep.subr.bf16.mxu1 (!%p138_p2), %v837_v5  ;;  %v845_v13 = vld [vmem:[%s1030_s1 + $0xd8] sm:$0xff] (!%p138_p2)   ;;  %v849_v17 = vld [vmem:[%s1030_s1 + $0xe0] sm:$0xff] (!%p138_p2)   ;;  %v853_v21 = vld [vmem:[%s1030_s1 + $0xe8] sm:$0xff] (!%p138_p2)  }
   0xb   : > { %v846_v14 = vld [vmem:[%s1030_s1 + $0x18] sm:$0xff] (!%p138_p2)   ;;  %v850_v18 = vld [vmem:[%s1030_s1 + $0x20] sm:$0xff] (!%p138_p2)   ;;  %v854_v22 = vld [vmem:[%s1030_s1 + $0x28] sm:$0xff] (!%p138_p2)  }
   0xc   : > { %770 = vmatpush3.bf16.msra.mxu0 (!%p138_p2), %v838_v6  ;;  %v847_v15 = vld [vmem:[%s1030_s1 + $0x98] sm:$0xff] (!%p138_p2)   ;;  %v851_v19 = vld [vmem:[%s1030_s1 + $0xa0] sm:$0xff] (!%p138_p2)   ;;  %v855_v23 = vld [vmem:[%s1030_s1 + $0xa8] sm:$0xff] (!%p138_p2)  }
   0xd   : > { %798 = vmatpush3.bf16.msra.mxu1 %v839_v7  ;;  %771 = vmatprep.subr.bf16.mxu0 %v840_v8  ;;  %s1034_s13 = smov (!%p161_p3, %s703_s13), 1  ;;  %v856_v24 = vld [vmem:[%s1030_s1 + $0x70] sm:$0xff]   ;;  %v860_v28 = vld [vmem:[%s1030_s1 + $0x78] sm:$0xff]  }
   0xe   : > { %799 = vmatprep.subr.bf16.mxu1 %v841_v9  ;;  %v857_v25 = vld [vmem:[%s1030_s1 + $0xf0] sm:$0xff]   ;;  %s766_s18 = sshll.u32 %s1034_s13, 5  ;;  %v861_v29 = vld [vmem:[%s1030_s1 + $0xf8] sm:$0xff]   ;;  %s823_s7 = smul.u32 12, %s1034_s13 }
   0xf   : > { %v858_v26 = vld [vmem:[%s1030_s1 + $0x30] sm:$0xff]   ;;  %s165_s27 = scalar_lea.vmem %s1029_s0, %s766_s18  ;;  %v862_v30 = vld [vmem:[%s1030_s1 + $0x38] sm:$0xff]  }
  0x10   : > { %772 = vmatpush3.bf16.msra.mxu0 %v842_v10  ;;  %v859_v27 = vld [vmem:[%s1030_s1 + $0xb0] sm:$0xff]   ;;  %v863_v31 = vld [vmem:[%s1030_s1 + $0xb8] sm:$0xff]   ;;  %v172_v32 = vld [vmem:[%s165_s27] sm:$0xf]  ;;  %s170_s10 = scalar_lea.vmem %s1032_s3, %s823_s7 }
  0x11   : > { %800 = vmatpush3.bf16.msra.mxu1 %v843_v11  ;;  %773 = vmatprep.subr.bf16.mxu0 %v844_v12  ;;  %v173_v33 = vld [vmem:[%s165_s27 + $0x8] sm:$0xf]  ;;  %v175_v34 = vld [vmem:[%s165_s27 + $0x4] sm:$0x1]  ;;  %v176_v35 = vld [vmem:[%s165_s27 + $0xc] sm:$0x1] }
  0x12   : > { %801 = vmatprep.subr.bf16.mxu1 %v845_v13  ;;  %v717_v36 = vcombine.low %v172_v32, %v175_v34  ;;  %v711_v37 = vld [vmem:[%s165_s27 + $0x8] sm:$0xf]  ;;  %v712_v38 = vld [vmem:[%s165_s27 + $0x10] sm:$0xf]  ;;  %v718_v39 = vcombine.low %v173_v33, %v176_v35  ;;  %v714_v40 = vld [vmem:[%s165_s27 + $0xc] sm:$0x1]  ;;  %v724_v4 = vcombine.low %v172_v32, %v173_v33 }
  0x13   : > { %v715_v41 = vld [vmem:[%s165_s27 + $0x14] sm:$0x1]  ;;  %v174_v42 = vld [vmem:[%s165_s27 + $0x10] sm:$0xf]  ;;  %v720_v45 = vcombine.low %v711_v37, %v714_v40  ;;  %v713_v51 = vld [vmem:[%s165_s27 + $0x18] sm:$0xf]  ;;  %v726_v10 = vcombine.low %v711_v37, %v712_v38 }
  0x14   : > { %774 = vmatpush3.bf16.msra.mxu0 %v846_v14  ;;  %v201_v43 = vshrl.u32 %v717_v36, 16  ;;  %v203_v44 = vshll.u32 %v717_v36, 16  ;;  %v721_v46 = vcombine.low %v712_v38, %v715_v41  ;;  %v177_v47 = vld [vmem:[%s165_s27 + $0x14] sm:$0x1]  ;;  %v208_v48 = vshrl.u32 %v718_v39, 16 }
  0x15   : > { %802 = vmatpush3.bf16.msra.mxu1 %v847_v15  ;;  %775 = vmatprep.subr.bf16.mxu0 %v848_v16  ;;  %v210_v49 = vshll.u32 %v718_v39, 16  ;;  %v719_v50 = vcombine.low %v174_v42, %v177_v47  ;;  %v716_v52 = vld [vmem:[%s165_s27 + $0x1c] sm:$0x1]  ;;  %v237_v54 = vshrl.u32 %v720_v45, 16  ;;  %v239_v55 = vshll.u32 %v720_v45, 16 }
  0x16   : > { %803 = vmatprep.subr.bf16.mxu1 %v849_v17  ;;  %v205_v53 = vrot.slane %v203_v44, 1  ;;  %v244_v56 = vshrl.u32 %v721_v46, 16  ;;  %v246_v58 = vshll.u32 %v721_v46, 16  ;;  %v722_v63 = vcombine.low %v713_v51, %v716_v52 }
  0x17   : > { %v212_v57 = vrot.slane %v210_v49, 1  ;;  %v215_v59 = vshrl.u32 %v719_v50, 16  ;;  %v217_v60 = vshll.u32 %v719_v50, 16  ;;  %v241_v62 = vrot.slane %v239_v55, 1 }
  0x18   : > { %776 = vmatpush3.bf16.msra.mxu0 %v850_v18  ;;  %v206_v61 = vor.u32 %v205_v53, %v201_v43  ;;  %v248_v1 = vrot.slane %v246_v58, 1  ;;  %v251_v5 = vshrl.u32 %v722_v63, 16  ;;  %v253_v6 = vshll.u32 %v722_v63, 16 }
  0x19   : > { %804 = vmatpush3.bf16.msra.mxu1 %v851_v19  ;;  %777 = vmatprep.subr.bf16.mxu0 %v852_v20  ;;  %v213_v0 = vor.u32 %v212_v57, %v208_v48  ;;  %v219_v2 = vrot.slane %v217_v60, 1  ;;  %v242_v3 = vor.u32 %v241_v62, %v237_v54  ;;  %v728_v16 = vcombine.low %v174_v42, %v174_v42  ;;  %v723_v19 = vld [vmem:[%s1031_s2] ss:$0 sm:$0xff] }
  0x1a   : > { %805 = vmatprep.subr.bf16.mxu1 %v853_v21  ;;  %v249_v8 = vor.u32 %v248_v1, %v244_v56  ;;  %v255_v11 = vrot.slane %v253_v6, 1  ;;  %v730_v17 = vcombine.low %v713_v51, %v713_v51 }
  0x1b   : > { %v725_v7 = vcombine.low %v206_v61, %v213_v0  ;;  %v220_v9 = vor.u32 %v219_v2, %v215_v59 }
  0x1c   : > { %778 = vmatpush3.bf16.msra.mxu0 %v854_v22  ;;  %v727_v12 = vcombine.low %v242_v3, %v249_v8  ;;  %v256_v14 = vor.u32 %v255_v11, %v251_v5 }
  0x1d   : > { %806 = vmatpush3.bf16.msra.mxu1 %v855_v23  ;;  %779 = vmatprep.subr.bf16.mxu0 %v856_v24  ;;  %v729_v13 = vcombine.low %v220_v9, %v220_v9 }
  0x1e   : > { %807 = vmatprep.subr.bf16.mxu1 %v857_v25  ;;  %574 = vmatprep.mubr.bf16.mxu0 %v725_v7  ;;  %v731_v15 = vcombine.low %v256_v14, %v256_v14 }
  0x1f   : > { %622 = vmatprep.mubr.bf16.mxu1 %v727_v12 }
  0x20   : > { %780 = vmatpush3.bf16.msra.mxu0 %v858_v26 }
  0x21   : > { %808 = vmatpush3.bf16.msra.mxu1 %v859_v27  ;;  %781 = vmatprep.subr.bf16.mxu0 %v860_v28 }
  0x22   : > { %809 = vmatprep.subr.bf16.mxu1 %v861_v29 }
  0x24   : > { %782 = vmatpush3.bf16.msra.mxu0 %v862_v30 }
  0x25   : > { %810 = vmatpush3.bf16.msra.mxu1 %v863_v31 }
  0x27   : > { %575 = vmatmul.mubr.bf16.vlgmr.msra.gmra.mrb[0].mxu0 %v724_v4 }
  0x28   : > { %582 = vmatprep.mubr.bf16.mxu0 %v729_v13  ;;  %623 = vmatmul.mubr.bf16.vlgmr.msra.gmra.mrb[0].mxu1 %v726_v10 }
  0x29   : > { %630 = vmatprep.mubr.bf16.mxu1 %v731_v15 }
  0x2f   : > { %583 = vmatmul.mubr.bf16.gmra.mrb[4].mxu0 %v728_v16 }
  0x30   : > { %631 = vmatmul.mubr.bf16.gmra.mrb[4].mxu1 %v730_v17 }
  0xfa   : > { %v783_v18 = vpop.f32.mrb[0].mxu0 }
  0xfb   : > { %v784_v20 = vpop.f32.mrb[1].mxu0  ;;  %v811_v21 = vpop.f32.mrb[0].mxu1 }
  0xfc   : > { %v785_v22 = vadd.f32 %v784_v20, %v783_v18  ;;  %v786_v23 = vpop.f32.mrb[2].mxu0  ;;  %v812_v24 = vpop.f32.mrb[1].mxu1 }
  0xfd   : > { %v787_v25 = vpop.f32.mrb[3].mxu0  ;;  %v813_v27 = vadd.f32 %v812_v24, %v811_v21  ;;  %v814_v28 = vpop.f32.mrb[2].mxu1 }
  0xfe   : > { %v577_v26 = vadd.f32 %v785_v22, %v723_v19  ;;  %v788_v29 = vadd.f32 %v787_v25, %v786_v23  ;;  %v815_v30 = vpop.f32.mrb[3].mxu1 }
  0xff   : > { %v816_v33 = vadd.f32 %v815_v30, %v814_v28 }
 0x100   : > { %v625_v31 = vadd.f32 %v813_v27, %v577_v26  ;;  %v580_v32 = vadd.f32 %v788_v29, %v723_v19 }
 0x102   : > { %v638_v34 = vmax.f32 %v625_v31, 0.0  ;;  %v628_v35 = vadd.f32 %v816_v33, %v580_v32  ;;  %v789_v36 = vpop.f32.mrb[4].mxu0 }
 0x103   : > { %v790_v37 = vpop.f32.mrb[5].mxu0  ;;  %v817_v40 = vpop.f32.mrb[4].mxu1 }
 0x104   : > { %v641_v38 = vpack.c.bf16 %v638_v34, %v638_v34  ;;  %v639_v39 = vmax.f32 %v628_v35, 0.0  ;;  %v791_v41 = vadd.f32 %v790_v37, %v789_v36  ;;  %v792_v42 = vpop.f32.mrb[6].mxu0  ;;  %v818_v43 = vpop.f32.mrb[5].mxu1 }
 0x105   : > { %v793_v44 = vpop.f32.mrb[7].mxu0  ;;  %v819_v47 = vadd.f32 %v818_v43, %v817_v40  ;;  %v820_v48 = vpop.f32.mrb[6].mxu1 }
 0x106   : > { %645 = vst.msk [vmem:[%s170_s10] sm:$0xf] %vm644_vm0, %v641_v38  ;;  %v642_v45 = vpack.c.bf16 %v639_v39, %v639_v39  ;;  %v585_v46 = vadd.f32 %v791_v41, %v723_v19  ;;  %v821_v49 = vpop.f32.mrb[7].mxu1 }
 0x108   : > { %646 = vst.msk [vmem:[%s170_s10 + $0x4] sm:$0xf] %vm644_vm0, %v642_v45  ;;  %v633_v50 = vadd.f32 %v819_v47, %v585_v46 }
 0x10a   : > { %v640_v51 = vmax.f32 %v633_v50, 0.0 }
 0x10c   : > { %v643_v52 = vpack.c.bf16 %v640_v51, %v640_v51 }
 0x10e   : > { %647 = vst.msk [vmem:[%s170_s10 + $0x8] sm:$0xf] %vm644_vm0, %v643_v52 }
 0x10f PF: > { %s13_s12 = sadd.s32 1, %s880_s12  }
 0x110   : > { %p10_p4 = scmp.ge.s32.totalorder %s13_s12, 4  }
 0x112   :  { %12 = sbr.rel (!%p10_p4) target bundleno = 1 (0x1), region = 63 }

// kernel: dqn_forward.6
= control target key start
LH: loop header
LB: loop body
LE: loop exit
PB: predicated region body
PF: predicated region fallthrough
CT: control target
= control target key end

     0   :  { %s937_s12 = smov 0   ;;  %s1115_s0 = inlined_call_operand.vmem [shape: bf16[2,3,10,64], index: 0, kind: input, shape index: {}]   ;;  %s1116_s1 = inlined_call_operand.vmem [shape: bf16[576,64], index: 1, kind: input, shape index: {}]   ;;  %s1117_s2 = inlined_call_operand.vmem [shape: f32[1,64], index: 2, kind: input, shape index: {}]   ;;  %s1118_s3 = inlined_call_operand.vmem [shape: bf16[2,1,8,64], index: 3, kind: output, shape index: {}]  }
   0x1 LB: > { %s730_s13 = sadd.s32 4294967295, %s912_s12   ;;  %p734_p0 = scmp.ge.s32.totalorder %s912_s12, 1  ;;  %s912_s12 = sphi %s937_s12, %s13_s12  }
   0x2   : > { %p137_p1 = scmp.lt.s32.totalorder %s912_s12, 3 }
   0x4   : > { %p138_p2 = pnand %p734_p0, %p137_p1 }
   0x5   : > { %p160_p3 = scmp.lt.s32.totalorder (!%p138_p2), %s730_s13, 1  ;;  %v869_v0 = vld [vmem:[%s1116_s1 + $0x40] sm:$0xff] (!%p138_p2)   ;;  %v871_v2 = vld [vmem:[%s1116_s1 + $0x48] sm:$0xff] (!%p138_p2)   ;;  %v875_v17 = vld [vmem:[%s1116_s1 + $0x50] sm:$0xff] (!%p138_p2)   ;;  %s914_s5 = smov (!%p138_p2), 64   ;;  %v915_v55 = vmov (!%p138_p2), 0.0  }
   0x6   : > { %141 = sbr.rel (%p138_p2) target bundleno = 379 (0x17b), region = 32  ;;  %v870_v1 = vld [vmem:[%s1116_s1] sm:$0xff] (!%p138_p2)   ;;  %790 = vmatprep.subr.bf16.mxu0 (!%p138_p2), %v869_v0  ;;  %v872_v3 = vld [vmem:[%s1116_s1 + $0x8] sm:$0xff] (!%p138_p2)   ;;  %v876_v22 = vld [vmem:[%s1116_s1 + $0x10] sm:$0xff] (!%p138_p2)   ;;  %vm238_vm0 = vcmask (!%p138_p2), 523264   ;;  %vm916_vm1 = vmmov (!%p138_p2), 0  }
   0x7   : > { %791 = vmatpush3.bf16.msra.mxu0 (!%p138_p2), %v870_v1  ;;  %v873_v4 = vld [vmem:[%s1116_s1 + $0xc0] sm:$0xff] (!%p138_p2)   ;;  %v877_v27 = vld [vmem:[%s1116_s1 + $0xc8] sm:$0xff] (!%p138_p2)   ;;  %v879_v31 = vld [vmem:[%s1116_s1 + $0x58] sm:$0xff] (!%p138_p2)   ;;  %vm675_vm2 = vcmask (!%p138_p2), 519168  }
   0x8   : > { %792 = vmatprep.subr.bf16.mxu0 (!%p138_p2), %v871_v2  ;;  %v874_v5 = vld [vmem:[%s1116_s1 + $0x80] sm:$0xff] (!%p138_p2)   ;;  %812 = vmatprep.subr.bf16.mxu1 (!%p138_p2), %v873_v4  ;;  %v878_v29 = vld [vmem:[%s1116_s1 + $0x88] sm:$0xff] (!%p138_p2)   ;;  %v880_v33 = vld [vmem:[%s1116_s1 + $0x18] sm:$0xff] (!%p138_p2)  }
   0x9   : > { %813 = vmatpush3.bf16.msra.mxu1 (!%p138_p2), %v874_v5  ;;  %v881_v35 = vld [vmem:[%s1116_s1 + $0xd0] sm:$0xff] (!%p138_p2)   ;;  %v883_v37 = vld [vmem:[%s1116_s1 + $0x60] sm:$0xff] (!%p138_p2)   ;;  %v885_v39 = vld [vmem:[%s1116_s1 + $0xd8] sm:$0xff] (!%p138_p2)  }
   0xa   : > { %814 = vmatprep.subr.bf16.mxu1 (!%p138_p2), %v877_v27  ;;  %v882_v36 = vld [vmem:[%s1116_s1 + $0x90] sm:$0xff] (!%p138_p2)   ;;  %v884_v38 = vld [vmem:[%s1116_s1 + $0x20] sm:$0xff] (!%p138_p2)   ;;  %v886_v40 = vld [vmem:[%s1116_s1 + $0x98] sm:$0xff] (!%p138_p2)  }
   0xb   : > { %793 = vmatpush3.bf16.msra.mxu0 (!%p138_p2), %v872_v3  ;;  %v887_v41 = vld [vmem:[%s1116_s1 + $0x68] sm:$0xff] (!%p138_p2)   ;;  %v889_v43 = vld [vmem:[%s1116_s1 + $0xe0] sm:$0xff] (!%p138_p2)   ;;  %v891_v45 = vld [vmem:[%s1116_s1 + $0x70] sm:$0xff] (!%p138_p2)  }
   0xc   : > { %794 = vmatprep.subr.bf16.mxu0 (!%p138_p2), %v875_v17  ;;  %v888_v42 = vld [vmem:[%s1116_s1 + $0x28] sm:$0xff] (!%p138_p2)   ;;  %v890_v44 = vld [vmem:[%s1116_s1 + $0xa0] sm:$0xff] (!%p138_p2)   ;;  %v892_v46 = vld [vmem:[%s1116_s1 + $0x30] sm:$0xff] (!%p138_p2)  }
   0xd   : > { %s1120_s13 = smov (!%p160_p3, %s730_s13), 1  ;;  %815 = vmatpush3.bf16.msra.mxu1 %v878_v29  ;;  %v893_v47 = vld [vmem:[%s1116_s1 + $0xe8] sm:$0xff]   ;;  %v895_v49 = vld [vmem:[%s1116_s1 + $0x78] sm:$0xff]   ;;  %v898_v53 = vld [vmem:[%s1116_s1 + $0xf0] sm:$0xff]  }
   0xe   : > { %s851_s20 = smul.u32 24, %s1120_s13  ;;  %816 = vmatprep.subr.bf16.mxu1 %v881_v35  ;;  %v894_v48 = vld [vmem:[%s1116_s1 + $0xa8] sm:$0xff]   ;;  %v896_v50 = vld [vmem:[%s1116_s1 + $0x38] sm:$0xff]   ;;  %v899_v54 = vld [vmem:[%s1116_s1 + $0xb0] sm:$0xff]   ;;  %s736_s19 = sshll.u32 %s1120_s13, 2 }
   0xf   : > { %795 = vmatpush3.bf16.msra.mxu0 %v876_v22  ;;  %v900_v56 = vld [vmem:[%s1116_s1 + $0xf8] sm:$0xff]   ;;  %v901_v1 = vld [vmem:[%s1116_s1 + $0x100] sm:$0xff]   ;;  %s168_s22 = scalar_lea.vmem %s1118_s3, %s736_s19 }
  0x10   : > { %s966_s27 = scalar_lea.vmem %s1115_s0, %s851_s20  ;;  %796 = vmatprep.subr.bf16.mxu0 %v879_v31  ;;  %v902_v57 = vld [vmem:[%s1116_s1 + $0xb8] sm:$0xff]   ;;  %v750_v17 = vld [vmem:[%s1117_s2] ss:$0 sm:$0xff] }
  0x11   : > { %v737_v6 = vld [vmem:[%s966_s27 + $0x8] sm:$0xf]  ;;  %v738_v7 = vld [vmem:[%s966_s27 + $0xc] sm:$0x1]  ;;  %v974_v8 = vld [vmem:[%s966_s27 + $0x10] sm:$0xf]  ;;  %817 = vmatpush3.bf16.msra.mxu1 %v882_v36 }
  0x12   : > { %v745_v9 = vcombine.low %v737_v6, %v737_v6  ;;  %v976_v10 = vcombine.low %v737_v6, %v738_v7  ;;  %v979_v11 = vld [vmem:[%s966_s27 + $0x14] sm:$0x1]  ;;  %v982_v12 = vld [vmem:[%s966_s27 + $0x10] sm:$0xe]  ;;  %v985_v13 = vld [vmem:[%s966_s27] sm:$0xf]  ;;  %818 = vmatprep.subr.bf16.mxu1 %v885_v39 }
  0x13   : > { %v748_v14 = vcombine.low %v974_v8, %v979_v11  ;;  %v749_v15 = vcombine.low %v982_v12, %v979_v11  ;;  %v992_v16 = vld [vmem:[%s966_s27 + $0x4] sm:$0x1]  ;;  %v739_v19 = vld [vmem:[%s966_s27 + $0x8] sm:$0xe]  ;;  %797 = vmatpush3.bf16.msra.mxu0 %v880_v33  ;;  %v172_v51 = vld [vmem:[%s966_s27] sm:$0xe] }
  0x14   : > { %202 = vrot.lane.b32.xlu0 %v745_v9, %s914_s5  ;;  %v743_v18 = vcombine.low %v985_v13, %v992_v16  ;;  %v747_v26 = vcombine.low %v739_v19, %v738_v7  ;;  %798 = vmatprep.subr.bf16.mxu0 %v883_v37  ;;  %v744_v52 = vcombine.low %v172_v51, %v992_v16  ;;  %v210_v59 = vshll.u32 %v976_v10, 16  ;;  %v903_v7 = vld [vmem:[%s1116_s1 + $0x108] sm:$0xff]  }
  0x15   : > { %v226_v20 = vshrl.u32 %v748_v14, 16  ;;  %v228_v21 = vshll.u32 %v748_v14, 16  ;;  %819 = vmatpush3.bf16.msra.mxu1 %v886_v40  ;;  %v208_v62 = vshrl.u32 %v976_v10, 16  ;;  %v905_v10 = vld [vmem:[%s1116_s1 + $0x118] sm:$0xff]  }
  0x16   : > { %v187_v23 = vshrl.u32 %v743_v18, 16  ;;  %v189_v24 = vshll.u32 %v743_v18, 16  ;;  %v217_v34 = vrot.slane %v747_v26, 1  ;;  %820 = vmatprep.subr.bf16.mxu1 %v889_v43  ;;  %v198_v58 = vrot.slane %v744_v52, 1 }
  0x17   : > { %v230_v25 = vrot.slane %v228_v21, 1  ;;  %799 = vmatpush3.bf16.msra.mxu0 %v884_v38  ;;  %v212_v63 = vrot.slane %v210_v59, 1 }
  0x18   : > { %v191_v28 = vrot.slane %v189_v24, 1  ;;  %800 = vmatprep.subr.bf16.mxu0 %v887_v41 }
  0x19   : > { %v231_v30 = vor.u32 %v230_v25, %v226_v20  ;;  %821 = vmatpush3.bf16.msra.mxu1 %v890_v44  ;;  %v213_v4 = vor.u32 %v212_v63, %v208_v62 }
  0x1a   : > { %v192_v32 = vor.u32 %v191_v28, %v187_v23  ;;  %822 = vmatprep.subr.bf16.mxu1 %v893_v47 }
  0x1b   : > { %232 = vrot.lane.b32.xlu1 %v231_v30, %s914_s5  ;;  %801 = vmatpush3.bf16.msra.mxu0 %v888_v42 }
  0x1c   : > { %193 = vrot.lane.b32.xlu0 %v192_v32, %s914_s5  ;;  %802 = vmatprep.subr.bf16.mxu0 %v891_v45 }
  0x1d   : > { %823 = vmatpush3.bf16.msra.mxu1 %v894_v48 }
  0x1e   : > { %824 = vmatprep.subr.bf16.mxu1 %v898_v53 }
  0x1f   : > { %218 = vrot.lane.b32.xlu1 %v217_v34, %s914_s5  ;;  %803 = vmatpush3.bf16.msra.mxu0 %v892_v46 }
  0x20   : > { %804 = vmatprep.subr.bf16.mxu0 %v895_v49 }
  0x21   : > { %825 = vmatpush3.bf16.msra.mxu1 %v899_v54 }
  0x22   : > { %826 = vmatprep.subr.bf16.mxu1 %v900_v56 }
  0x23   : > { %805 = vmatpush3.bf16.msra.mxu0 %v896_v50 }
  0x24   : > { %839 = vmatprep.subr.bf16.mxu0 %v915_v55 }
  0x25   : > { %827 = vmatpush3.bf16.msra.mxu1 %v902_v57 }
  0x86   : > { %v203_v60 = vpop.permute.xlu0 %202 }
  0x87   : > { %v245_v61 = vsel %vm238_vm0, %v198_v58, %v203_v60 }
  0x88   : > { %585 = vmatprep.mubr.bf16.mxu0 %v245_v61 }
  0x8d   : > { %v233_v0 = vpop.permute.xlu1 %232 }
  0x8e   : > { %v194_v2 = vpop.permute.xlu0 %193  ;;  %v253_v3 = vsel %vm238_vm0, %v974_v8, %v233_v0  ;;  %v904_v8 = vld [vmem:[%s1116_s1 + $0x110] sm:$0xff]  }
  0x8f   : > { %v241_v5 = vsel %vm238_vm0, %v985_v13, %v194_v2  ;;  %625 = vmatprep.mubr.bf16.mxu1 %v253_v3  ;;  %v237_v13 = vrot.slane %v749_v15, 1 }
  0x90   : > { %586 = vmatmul.mubr.bf16.vlgmr.msra.gmra.mrb[0].mxu0 %v241_v5 }
  0x91   : > { %840 = vmatpush3.bf16.msra.mxu0 %v901_v1  ;;  %v219_v6 = vpop.permute.xlu1 %218  ;;  %847 = vmatprep.mubr.msk.bf16.mxu0 %vm916_vm1, %v915_v55 }
  0x92   : > { %841 = vmatprep.subr.bf16.mxu0 %v915_v55  ;;  %v249_v9 = vsel %vm238_vm0, %v213_v4, %v219_v6 }
  0x93   : > { %626 = vmatmul.mubr.bf16.vlgmr.msra.gmra.mrb[0].mxu1 %v249_v9 }
  0x95   : > { %842 = vmatpush3.bf16.msra.mxu0 %v903_v7 }
  0x96   : > { %843 = vmatprep.subr.bf16.mxu0 %v915_v55 }
  0x99   : > { %844 = vmatpush3.bf16.msra.mxu0 %v904_v8 }
  0x9a   : > { %845 = vmatprep.subr.bf16.mxu0 %v915_v55 }
  0x9d   : > { %846 = vmatpush3.bf16.msra.mxu0 %v905_v10 }
  0xa0   : > { %848 = vmatmul.mubr.msk.bf16.vlgmr.msra.gmra.mrb[4].mxu0 %vm238_vm0, %v237_v13 }
 0x163   : > { %v806_v14 = vpop.f32.mrb[0].mxu0 }
 0x164   : > { %v807_v16 = vpop.f32.mrb[1].mxu0 }
 0x165   : > { %v808_v18 = vadd.f32 %v807_v16, %v806_v14  ;;  %v809_v19 = vpop.f32.mrb[2].mxu0 }
 0x166   : > { %v810_v20 = vpop.f32.mrb[3].mxu0  ;;  %v828_v21 = vpop.f32.mrb[0].mxu1 }
 0x167   : > { %v829_v22 = vpop.f32.mrb[1].mxu1  ;;  %v588_v23 = vadd.f32 %v808_v18, %v750_v17 }
 0x168   : > { %v830_v24 = vadd.f32 %v829_v22, %v828_v21  ;;  %v831_v25 = vpop.f32.mrb[2].mxu1 }
 0x169   : > { %v832_v11 = vpop.f32.mrb[3].mxu1 }
 0x16a   : > { %v628_v12 = vadd.f32 %v830_v24, %v588_v23 }
 0x173   : > { %v667_v15 = vpop.f32.mrb[4].mxu0 }
 0x174   : > { %v668_v26 = vadd.f32 %v667_v15, %v628_v12  ;;  %v849_v27 = vpop.f32.mrb[5].mxu0 }
 0x175   : > { %v670_v28 = vpop.f32.mrb[6].mxu0 }
 0x176   : > { %v673_v29 = vmax.f32 %v668_v26, 0.0  ;;  %v850_v30 = vpop.f32.mrb[7].mxu0 }
 0x178   : > { %v674_v31 = vpack.c.bf16 %v673_v29, %v673_v29 }
 0x17a   : > { %676 = vst.msk [vmem:[%s168_s22] sm:$0xf] %vm675_vm2, %v674_v31 }
 0x17b PF: > { %s13_s12 = sadd.s32 1, %s912_s12  }
 0x17c   : > { %p10_p4 = scmp.ge.s32.totalorder %s13_s12, 4  }
 0x17e   :  { %12 = sbr.rel (!%p10_p4) target bundleno = 1 (0x1), region = 64 }

// kernel: dqn_forward.7
= control target key start
LH: loop header
LB: loop body
LE: loop exit
PB: predicated region body
PF: predicated region fallthrough
CT: control target
= control target key end

     0   :  { %v1073_v0 = vmov 0.0   ;;  %vm1074_vm0 = vmmov 0   ;;  %vm61_vm1 = vcmask 523264   ;;  %vm776_vm2 = vcmask 48128   ;;  %s1344_s1 = inlined_call_operand.vmem [shape: bf16[64,512], index: 1, kind: input, shape index: {}]   ;;  %s1345_s3 = inlined_call_operand.vmem [shape: bf16[512,6], index: 3, kind: input, shape index: {}]   ;;  %s1346_s0 = inlined_call_operand.vmem [shape: bf16[8,64], index: 0, kind: input, shape index: {}]   ;;  %s1347_s2 = inlined_call_operand.vmem [shape: f32[1,512], index: 2, kind: input, shape index: {}]   ;;  %s1348_s4 = inlined_call_operand.vmem [shape: f32[1,6], index: 4, kind: input, shape index: {}]   ;;  %s1349_s5 = inlined_call_operand.vmem [shape: f32[8,6], index: 5, kind: output, shape index: {}]  }
   0x1   :  { %895 = vmatprep.subr.bf16.mxu1 %v1073_v0  ;;  %v1025_v1 = vld [vmem:[%s1344_s1] ss:$16 sps:$4 sm:$0xff]   ;;  %903 = vmatprep.mubr.msk.bf16.mxu1 %vm1074_vm0, %v1073_v0  ;;  %v1029_v7 = vld [vmem:[%s1344_s1 + $0x4] ss:$16 sps:$4 sm:$0xff]   ;;  %v1039_v8 = vld [vmem:[%s1345_s3 + $0x48] sm:$0xff]  }
   0x2   :  { %919 = vmatprep.subr.bf16.mxu0 %v1073_v0  ;;  %935 = vmatprep.mubr.msk.bf16.mxu0 %vm1074_vm0, %v1073_v0  ;;  %v1026_v2 = vld [vmem:[%s1344_s1 + $0x20] ss:$16 sps:$4 sm:$0xff]   ;;  %v1030_v9 = vld [vmem:[%s1344_s1 + $0x24] ss:$16 sps:$4 sm:$0xff]   ;;  %v1034_v14 = vld [vmem:[%s1345_s3 + $0x8] sm:$0xff]  }
   0x3   :  { %896 = vmatpush3.bf16.msra.mxu1 %v1025_v1  ;;  %v1027_v3 = vld [vmem:[%s1344_s1 + $0x40] ss:$16 sps:$4 sm:$0xff]   ;;  %v1031_v11 = vld [vmem:[%s1344_s1 + $0x44] ss:$16 sps:$4 sm:$0xff]   ;;  %v1036_v16 = vld [vmem:[%s1345_s3 + $0x18] sm:$0xff]  }
   0x4   :  { %897 = vmatprep.subr.bf16.mxu1 %v1073_v0  ;;  %v1028_v4 = vld [vmem:[%s1344_s1 + $0x60] ss:$16 sps:$4 sm:$0xff]   ;;  %v1032_v12 = vld [vmem:[%s1344_s1 + $0x64] ss:$16 sps:$4 sm:$0xff]   ;;  %v1040_v18 = vld [vmem:[%s1345_s3 + $0x28] sm:$0xff]  }
   0x5   :  { %v1129_v5 = vld [vmem:[%s1346_s0] sm:$0xf]  ;;  %v1041_v10 = vld [vmem:[%s1345_s3 + $0x50] sm:$0xff]   ;;  %v1043_v20 = vld [vmem:[%s1345_s3 + $0x58] sm:$0xff]  }
   0x6   :  { %v1037_v6 = vld [vmem:[%s1345_s3 + $0x40] sm:$0xff]   ;;  %v1035_v15 = vld [vmem:[%s1345_s3 + $0x10] sm:$0xff]   ;;  %v1044_v21 = vld [vmem:[%s1345_s3 + $0x38] sm:$0xff]  }
   0x7   :  { %898 = vmatpush3.bf16.msra.mxu1 %v1026_v2  ;;  %920 = vmatpush3.bf16.msra.mxu0 %v1037_v6  ;;  %v1033_v13 = vld [vmem:[%s1345_s3] sm:$0xff]   ;;  %v1042_v19 = vld [vmem:[%s1345_s3 + $0x30] sm:$0xff]   ;;  %v1046_v23 = vld [vmem:[%s1345_s3 + $0x68] sm:$0xff]  }
   0x8   :  { %899 = vmatprep.subr.bf16.mxu1 %v1073_v0  ;;  %921 = vmatprep.subr.bf16.mxu0 %v1073_v0  ;;  %v1038_v17 = vld [vmem:[%s1345_s3 + $0x20] sm:$0xff]   ;;  %v1047_v24 = vld [vmem:[%s1345_s3 + $0x70] sm:$0xff]   ;;  %v1048_v25 = vld [vmem:[%s1345_s3 + $0x78] sm:$0xff]  }
   0x9   :  { %v1045_v22 = vld [vmem:[%s1345_s3 + $0x60] sm:$0xff]   ;;  %v1049_v41 = vld [vmem:[%s1344_s1 + $0x8] ss:$16 sps:$4 sm:$0xff]   ;;  %v1053_v46 = vld [vmem:[%s1344_s1 + $0xc] ss:$16 sps:$4 sm:$0xff]  }
   0xa   :  { %v782_v26 = vld [vmem:[%s1347_s2] ss:$0 sm:$0xff]  ;;  %v788_v34 = vld [vmem:[%s1347_s2 + $0x1] ss:$0 sm:$0xff]  ;;  %v1050_v43 = vld [vmem:[%s1344_s1 + $0x28] ss:$16 sps:$4 sm:$0xff]  }
   0xb   :  { %900 = vmatpush3.bf16.msra.mxu1 %v1027_v3  ;;  %922 = vmatpush3.bf16.msra.mxu0 %v1039_v8  ;;  %v1051_v44 = vld [vmem:[%s1344_s1 + $0x48] ss:$16 sps:$4 sm:$0xff]   ;;  %v1054_v47 = vld [vmem:[%s1344_s1 + $0x2c] ss:$16 sps:$4 sm:$0xff]   ;;  %v1057_v50 = vld [vmem:[%s1345_s3 + $0x80] sm:$0xff]  }
   0xc   :  { %901 = vmatprep.subr.bf16.mxu1 %v1073_v0  ;;  %923 = vmatprep.subr.bf16.mxu0 %v1073_v0  ;;  %v1052_v45 = vld [vmem:[%s1344_s1 + $0x68] ss:$16 sps:$4 sm:$0xff]   ;;  %v1055_v48 = vld [vmem:[%s1344_s1 + $0x4c] ss:$16 sps:$4 sm:$0xff]   ;;  %v1059_v52 = vld [vmem:[%s1345_s3 + $0x90] sm:$0xff]  }
   0xd   :  { %v1056_v49 = vld [vmem:[%s1344_s1 + $0x6c] ss:$16 sps:$4 sm:$0xff]   ;;  %v1062_v54 = vld [vmem:[%s1345_s3 + $0xc0] sm:$0xff]   ;;  %v1065_v58 = vld [vmem:[%s1345_s3 + $0xb0] sm:$0xff]  }
   0xe   :  { %v1058_v51 = vld [vmem:[%s1345_s3 + $0x88] sm:$0xff]   ;;  %v1060_v53 = vld [vmem:[%s1345_s3 + $0x98] sm:$0xff]   ;;  %v1061_v55 = vld [vmem:[%s1345_s3 + $0xa0] sm:$0xff]  }
   0xf   :  { %902 = vmatpush3.bf16.msra.mxu1 %v1028_v4  ;;  %924 = vmatpush3.bf16.msra.mxu0 %v1041_v10  ;;  %v1064_v56 = vld [vmem:[%s1345_s3 + $0xc8] sm:$0xff]   ;;  %v1066_v59 = vld [vmem:[%s1345_s3 + $0xd0] sm:$0xff]   ;;  %v1067_v60 = vld [vmem:[%s1345_s3 + $0xb8] sm:$0xff]  }
  0x10   :  { %907 = vmatprep.subr.bf16.mxu1 %v1073_v0  ;;  %925 = vmatprep.subr.bf16.mxu0 %v1073_v0  ;;  %v1063_v57 = vld [vmem:[%s1345_s3 + $0xa8] sm:$0xff]   ;;  %v1068_v61 = vld [vmem:[%s1345_s3 + $0xd8] sm:$0xff]   ;;  %v1069_v62 = vld [vmem:[%s1345_s3 + $0xe0] sm:$0xff]  }
  0x11   :  { %v1070_v63 = vld [vmem:[%s1345_s3 + $0xe8] sm:$0xff]   ;;  %v1071_v1 = vld [vmem:[%s1345_s3 + $0xf0] sm:$0xff]   ;;  %v1072_v2 = vld [vmem:[%s1345_s3 + $0xf8] sm:$0xff]  }
  0x12   :  { %904 = vmatmul.mubr.msk.bf16.vlgmr.msra.gmra.mrb[0].mxu1 %vm61_vm1, %v1129_v5 }
  0x13   :  { %908 = vmatpush3.bf16.msra.mxu1 %v1029_v7  ;;  %915 = vmatprep.mubr.msk.bf16.mxu1 %vm1074_vm0, %v1073_v0 }
  0x14   :  { %909 = vmatprep.subr.bf16.mxu1 %v1073_v0  ;;  %926 = vmatpush3.bf16.msra.mxu0 %v1043_v20 }
  0x15   :  { %927 = vmatprep.subr.bf16.mxu0 %v1073_v0 }
  0x17   :  { %910 = vmatpush3.bf16.msra.mxu1 %v1030_v9 }
  0x18   :  { %911 = vmatprep.subr.bf16.mxu1 %v1073_v0  ;;  %928 = vmatpush3.bf16.msra.mxu0 %v1045_v22 }
  0x19   :  { %929 = vmatprep.subr.bf16.mxu0 %v1073_v0 }
  0x1b   :  { %912 = vmatpush3.bf16.msra.mxu1 %v1031_v11 }
  0x1c   :  { %913 = vmatprep.subr.bf16.mxu1 %v1073_v0  ;;  %930 = vmatpush3.bf16.msra.mxu0 %v1046_v23 }
  0x1d   :  { %931 = vmatprep.subr.bf16.mxu0 %v1073_v0 }
  0x1f   :  { %914 = vmatpush3.bf16.msra.mxu1 %v1032_v12  ;;  %v810_v12 = vld [vmem:[%s1347_s2 + $0x2] ss:$0 sm:$0xff] }
  0x20   :  { %939 = vmatprep.subr.bf16.mxu1 %v1073_v0  ;;  %932 = vmatpush3.bf16.msra.mxu0 %v1047_v24 }
  0x21   :  { %933 = vmatprep.subr.bf16.mxu0 %v1073_v0 }
  0x22   :  { %916 = vmatmul.mubr.msk.bf16.vlgmr.msra.gmra.mrb[4].mxu1 %vm61_vm1, %v1129_v5 }
  0x23   :  { %940 = vmatpush3.bf16.msra.mxu1 %v1033_v13  ;;  %955 = vmatprep.mubr.msk.bf16.mxu1 %vm1074_vm0, %v1073_v0 }
  0x24   :  { %941 = vmatprep.subr.bf16.mxu1 %v1073_v0  ;;  %934 = vmatpush3.bf16.msra.mxu0 %v1048_v25 }
  0x25   :  { %959 = vmatprep.subr.bf16.mxu0 %v1073_v0 }
  0x27   :  { %942 = vmatpush3.bf16.msra.mxu1 %v1034_v14 }
  0x28   :  { %943 = vmatprep.subr.bf16.mxu1 %v1073_v0 }
  0x2b   :  { %944 = vmatpush3.bf16.msra.mxu1 %v1035_v15 }
  0x2c   :  { %945 = vmatprep.subr.bf16.mxu1 %v1073_v0 }
  0x2f   :  { %946 = vmatpush3.bf16.msra.mxu1 %v1036_v16 }
  0x30   :  { %947 = vmatprep.subr.bf16.mxu1 %v1073_v0 }
  0x33   :  { %948 = vmatpush3.bf16.msra.mxu1 %v1038_v17 }
  0x34   :  { %949 = vmatprep.subr.bf16.mxu1 %v1073_v0 }
  0x37   :  { %950 = vmatpush3.bf16.msra.mxu1 %v1040_v18 }
  0x38   :  { %951 = vmatprep.subr.bf16.mxu1 %v1073_v0 }
  0x3b   :  { %952 = vmatpush3.bf16.msra.mxu1 %v1042_v19  ;;  %v824_v19 = vld [vmem:[%s1347_s2 + $0x3] ss:$0 sm:$0xff] }
  0x3c   :  { %953 = vmatprep.subr.bf16.mxu1 %v1073_v0 }
  0x3f   :  { %954 = vmatpush3.bf16.msra.mxu1 %v1044_v21 }
  0x40   :  { %971 = vmatprep.subr.bf16.mxu1 %v1073_v0 }
  0xe5   :  { %v99_v27 = vpop.f32.mrb[0].mxu1 }
  0xe6   :  { %v100_v28 = vadd.f32 %v782_v26, %v99_v27  ;;  %v905_v29 = vpop.f32.mrb[1].mxu1 }
  0xe7   :  { %v102_v30 = vpop.f32.mrb[2].mxu1 }
  0xe8   :  { %v105_v31 = vmax.f32 %v100_v28, 0.0  ;;  %v906_v32 = vpop.f32.mrb[3].mxu1 }
  0xea   :  { %v106_v33 = vpack.c.bf16 %v105_v31, %v105_v31 }
  0xec   :  { %956 = vmatmul.mubr.bf16.vlgmr.msra.gmra.mrb[8].mxu1 %v106_v33  ;;  %v838_v33 = vld [vmem:[%s1348_s4] ss:$0 sm:$0xff] }
  0xed   :  { %987 = vmatprep.mubr.msk.bf16.mxu1 %vm1074_vm0, %v1073_v0  ;;  %972 = vmatpush3.bf16.msra.mxu1 %v1057_v50 }
  0xee   :  { %973 = vmatprep.subr.bf16.mxu1 %v1073_v0 }
  0xf1   :  { %974 = vmatpush3.bf16.msra.mxu1 %v1058_v51 }
  0xf2   :  { %975 = vmatprep.subr.bf16.mxu1 %v1073_v0 }
  0xf5   :  { %v196_v35 = vpop.f32.mrb[4].mxu1  ;;  %976 = vmatpush3.bf16.msra.mxu1 %v1059_v52 }
  0xf6   :  { %v197_v36 = vadd.f32 %v788_v34, %v196_v35  ;;  %v917_v37 = vpop.f32.mrb[5].mxu1  ;;  %977 = vmatprep.subr.bf16.mxu1 %v1073_v0 }
  0xf7   :  { %v199_v38 = vpop.f32.mrb[6].mxu1 }
  0xf8   :  { %v202_v39 = vmax.f32 %v197_v36, 0.0  ;;  %v918_v40 = vpop.f32.mrb[7].mxu1 }
  0xf9   :  { %978 = vmatpush3.bf16.msra.mxu1 %v1060_v53 }
  0xfa   :  { %v203_v42 = vpack.c.bf16 %v202_v39, %v202_v39  ;;  %979 = vmatprep.subr.bf16.mxu1 %v1073_v0 }
  0xfc   :  { %936 = vmatmul.mubr.bf16.vlgmr.msra.gmra.mrb[0].mxu0 %v203_v42 }
  0xfd   :  { %960 = vmatpush3.bf16.msra.mxu0 %v1049_v41  ;;  %967 = vmatprep.mubr.msk.bf16.mxu0 %vm1074_vm0, %v1073_v0 }
  0xfe   :  { %961 = vmatprep.subr.bf16.mxu0 %v1073_v0  ;;  %980 = vmatpush3.bf16.msra.mxu1 %v1061_v55 }
  0xff   :  { %981 = vmatprep.subr.bf16.mxu1 %v1073_v0 }
 0x101   :  { %962 = vmatpush3.bf16.msra.mxu0 %v1050_v43 }
 0x102   :  { %963 = vmatprep.subr.bf16.mxu0 %v1073_v0  ;;  %982 = vmatpush3.bf16.msra.mxu1 %v1063_v57 }
 0x103   :  { %983 = vmatprep.subr.bf16.mxu1 %v1073_v0 }
 0x105   :  { %964 = vmatpush3.bf16.msra.mxu0 %v1051_v44 }
 0x106   :  { %965 = vmatprep.subr.bf16.mxu0 %v1073_v0  ;;  %984 = vmatpush3.bf16.msra.mxu1 %v1065_v58 }
 0x107   :  { %985 = vmatprep.subr.bf16.mxu1 %v1073_v0 }
 0x109   :  { %966 = vmatpush3.bf16.msra.mxu0 %v1052_v45 }
 0x10a   :  { %991 = vmatprep.subr.bf16.mxu0 %v1073_v0  ;;  %986 = vmatpush3.bf16.msra.mxu1 %v1067_v60 }
 0x10c   :  { %968 = vmatmul.mubr.msk.bf16.vlgmr.msra.gmra.mrb[4].mxu0 %vm61_vm1, %v1129_v5 }
 0x10d   :  { %992 = vmatpush3.bf16.msra.mxu0 %v1053_v46  ;;  %999 = vmatprep.mubr.msk.bf16.mxu0 %vm1074_vm0, %v1073_v0 }
 0x10e   :  { %993 = vmatprep.subr.bf16.mxu0 %v1073_v0 }
 0x111   :  { %994 = vmatpush3.bf16.msra.mxu0 %v1054_v47 }
 0x112   :  { %995 = vmatprep.subr.bf16.mxu0 %v1073_v0 }
 0x115   :  { %996 = vmatpush3.bf16.msra.mxu0 %v1055_v48 }
 0x116   :  { %997 = vmatprep.subr.bf16.mxu0 %v1073_v0 }
 0x119   :  { %998 = vmatpush3.bf16.msra.mxu0 %v1056_v49 }
 0x11a   :  { %1003 = vmatprep.subr.bf16.mxu0 %v1073_v0 }
 0x11c   :  { %1000 = vmatmul.mubr.msk.bf16.vlgmr.msra.gmra.mrb[8].mxu0 %vm61_vm1, %v1129_v5 }
 0x11d   :  { %1019 = vmatprep.mubr.msk.bf16.mxu0 %vm1074_vm0, %v1073_v0  ;;  %1004 = vmatpush3.bf16.msra.mxu0 %v1062_v54 }
 0x11e   :  { %1005 = vmatprep.subr.bf16.mxu0 %v1073_v0 }
 0x121   :  { %1006 = vmatpush3.bf16.msra.mxu0 %v1064_v56 }
 0x122   :  { %1007 = vmatprep.subr.bf16.mxu0 %v1073_v0 }
 0x125   :  { %1008 = vmatpush3.bf16.msra.mxu0 %v1066_v59 }
 0x126   :  { %1009 = vmatprep.subr.bf16.mxu0 %v1073_v0 }
 0x129   :  { %1010 = vmatpush3.bf16.msra.mxu0 %v1068_v61 }
 0x12a   :  { %1011 = vmatprep.subr.bf16.mxu0 %v1073_v0 }
 0x12d   :  { %1012 = vmatpush3.bf16.msra.mxu0 %v1069_v62 }
 0x12e   :  { %1013 = vmatprep.subr.bf16.mxu0 %v1073_v0 }
 0x131   :  { %1014 = vmatpush3.bf16.msra.mxu0 %v1070_v63 }
 0x132   :  { %1015 = vmatprep.subr.bf16.mxu0 %v1073_v0 }
 0x135   :  { %1016 = vmatpush3.bf16.msra.mxu0 %v1071_v1 }
 0x136   :  { %1017 = vmatprep.subr.bf16.mxu0 %v1073_v0 }
 0x139   :  { %1018 = vmatpush3.bf16.msra.mxu0 %v1072_v2 }
 0x1bf   :  { %v390_v3 = vpop.f32.mrb[8].mxu1 }
 0x1c0   :  { %v957_v4 = vpop.f32.mrb[9].mxu1 }
 0x1c1   :  { %v393_v5 = vpop.f32.mrb[10].mxu1 }
 0x1c2   :  { %v958_v6 = vpop.f32.mrb[11].mxu1 }
 0x1cf   :  { %v302_v7 = vpop.f32.mrb[0].mxu0 }
 0x1d0   :  { %v391_v8 = vadd.f32 %v390_v3, %v302_v7  ;;  %v937_v9 = vpop.f32.mrb[1].mxu0 }
 0x1d1   :  { %v305_v10 = vpop.f32.mrb[2].mxu0 }
 0x1d2   :  { %v938_v11 = vpop.f32.mrb[3].mxu0 }
 0x1df   :  { %v469_v13 = vpop.f32.mrb[4].mxu0 }
 0x1e0   :  { %v470_v0 = vadd.f32 %v810_v12, %v469_v13  ;;  %v969_v14 = vpop.f32.mrb[5].mxu0 }
 0x1e1   :  { %v472_v15 = vpop.f32.mrb[6].mxu0 }
 0x1e2   :  { %v475_v16 = vmax.f32 %v470_v0, 0.0  ;;  %v970_v17 = vpop.f32.mrb[7].mxu0 }
 0x1e4   :  { %v476_v18 = vpack.c.bf16 %v475_v16, %v475_v16 }
 0x1e6   :  { %988 = vmatmul.mubr.bf16.vlgmr.msra.gmra.mrb[12].mxu1 %v476_v18 }
 0x1ef   :  { %v655_v20 = vpop.f32.mrb[8].mxu0 }
 0x1f0   :  { %v656_v21 = vadd.f32 %v824_v19, %v655_v20  ;;  %v1001_v22 = vpop.f32.mrb[9].mxu0 }
 0x1f1   :  { %v658_v23 = vpop.f32.mrb[10].mxu0 }
 0x1f2   :  { %v661_v24 = vmax.f32 %v656_v21, 0.0  ;;  %v1002_v25 = vpop.f32.mrb[11].mxu0 }
 0x1f4   :  { %v662_v26 = vpack.c.bf16 %v661_v24, %v661_v24 }
 0x1f6   :  { %1020 = vmatmul.mubr.bf16.vlgmr.msra.gmra.mrb[12].mxu0 %v662_v26 }
 0x2b9   :  { %v575_v27 = vpop.f32.mrb[12].mxu1 }
 0x2ba   :  { %v581_v28 = vadd.f32 %v575_v27, %v391_v8  ;;  %v989_v29 = vpop.f32.mrb[13].mxu1 }
 0x2bb   :  { %v578_v30 = vpop.f32.mrb[14].mxu1 }
 0x2bc   :  { %v990_v31 = vpop.f32.mrb[15].mxu1 }
 0x2c9   :  { %v761_v32 = vpop.f32.mrb[12].mxu0 }
 0x2ca   :  { %v767_v34 = vadd.f32 %v761_v32, %v581_v28  ;;  %v1021_v35 = vpop.f32.mrb[13].mxu0 }
 0x2cb   :  { %v764_v36 = vpop.f32.mrb[14].mxu0 }
 0x2cc   :  { %v775_v37 = vadd.f32 %v838_v33, %v767_v34  ;;  %v1022_v38 = vpop.f32.mrb[15].mxu0 }
 0x2ce   :  { %777 = vst.msk [vmem:[%s1349_s5] sm:$0xff] %vm776_vm2, %v775_v37 }

</bundles_post_ra>
